<compile_context>
chip_gen: v6e
topology: v6e:2x2x1
jax: 0.10.0
libtpu: 0.0.40
codegen_flags: <defaults>
</compile_context>

<pallas_src>
import numpy as np
import jax
import jax.numpy as jnp
from jax.experimental import pallas as pl
from jax.experimental.pallas import tpu as pltpu

_EPS = 1e-5  # BatchNorm2d default eps


def _st_gcn_kernel(x_ref, sel_ref, wstk_ref, bgf_ref, wtaps_ref, bt_ref,
                   tmask_ref, bnp_ref, er_ref, ee_ref, alpha_ref, out_ref):
    # x_ref    : (R, VC)        2D lane-dense activations, row r = t*N + n
    # sel_ref  : (R, T*VC)      gcn lane-block selector  [t == r // N]
    # wstk_ref : (T*VC, VC)     stacked kron(A[t], Wg) weights (matmul dtype)
    # bgf_ref  : (R, VC)        gcn bias pushed through A, expanded per row
    # wtaps_ref: (K, VC, VC)    per-tap block-diag temporal weights (matmul dtype)
    # bt_ref   : (1, VC)        temporal-conv bias tiled over joints
    # tmask_ref: (K, R, 1)      per-tap row validity (temporal zero padding)
    # bnp_ref  : (4, C)         rows: bn1_gamma, bn1_beta, bn2_gamma, bn2_beta
    # alpha_ref: (2,) in SMEM   PReLU alphas (tcn PReLU, final PReLU)
    f32 = jnp.float32
    R, VC = x_ref.shape
    T = wstk_ref.shape[0] // VC
    nb = R // T                      # batch rows per frame
    K = wtaps_ref.shape[0]
    P = (K - 1) // 2
    C = bnp_ref.shape[1]
    V = VC // C
    inv_cnt = 1.0 / (R * V)          # 1 / (N*T*V) samples per channel
    cdt = wstk_ref.dtype             # MXU operand dtype (f32 or bf16)

    x = x_ref[...]                   # (R, VC) f32, kept f32 for the residual

    # ---- gcn: 1x1 conv + einsum('nctv,tvw->nctw') as ONE sublane-full matmul
    # Xblk[r, t*VC+d] = x[r, d] * [t == r // nb];  z = Xblk @ stack_t(kron(A[t], Wg))
    xblk = jnp.concatenate([x.astype(cdt)] * T, axis=1) * sel_ref[...]   # (R, T*VC)
    z = jnp.dot(xblk, wstk_ref[...], preferred_element_type=f32) + bgf_ref[...]

    bnp = bnp_ref[...]               # (4, C)
    er = er_ref[...]                 # (VC, C) lane -> channel fold
    ee = ee_ref[...]                 # (C, VC) channel -> lane expand

    def bn_scale_shift(h, gamma, beta):
        # Training-mode BatchNorm2d over (N, T, V): cross-sublane reductions on
        # the XLU, tiny channel folds on the MXU, all statistics in f32.
        s_lane = jnp.sum(h, axis=0, keepdims=True)                         # (1, VC)
        q_lane = jnp.sum(h * h, axis=0, keepdims=True)                     # (1, VC)
        mean_c = jnp.dot(s_lane, er, preferred_element_type=f32) * inv_cnt  # (1, C)
        msq_c = jnp.dot(q_lane, er, preferred_element_type=f32) * inv_cnt
        var_c = msq_c - mean_c * mean_c                                     # biased
        scale_c = gamma * jax.lax.rsqrt(var_c + _EPS)
        shift_c = beta - mean_c * scale_c
        scale_l = jnp.dot(scale_c, ee, preferred_element_type=f32)          # (1, VC)
        shift_l = jnp.dot(shift_c, ee, preferred_element_type=f32)
        return scale_l, shift_l

    # ---- tcn[0]: BatchNorm2d, tcn[1]: PReLU ----
    sc1, sh1 = bn_scale_shift(z, bnp[0:1], bnp[1:2])
    z = z * sc1 + sh1
    a1 = alpha_ref[0]
    z = jnp.where(z >= 0, z, a1 * z)

    # ---- tcn[2]: temporal conv (K,1), padding (P,0), stride 1 ----
    # No materialized im2col: K accumulated matmuls on row-shifted views.
    # A temporal shift of d frames is a shift of d*nb rows (XLU pltpu.roll);
    # rows the zero-padding would have supplied are masked out. The accumulator
    # stays in registers; a single lane-dense store at the end of the kernel.
    t2 = jnp.dot(z.astype(cdt), wtaps_ref[P], preferred_element_type=f32)   # centre tap
    for k in range(K):
        d = k - P
        if d == 0:
            continue
        zs = pltpu.roll(z, shift=(-d * nb) % R, axis=0) * tmask_ref[k]
        t2 = t2 + jnp.dot(zs.astype(cdt), wtaps_ref[k], preferred_element_type=f32)
    t2 = t2 + bt_ref[...]

    # ---- tcn[3]: BatchNorm2d  (tcn[4] Dropout(p=0) is a no-op) ----
    sc2, sh2 = bn_scale_shift(t2, bnp[2:3], bnp[3:4])
    t2 = t2 * sc2 + sh2

    # ---- identity residual + final PReLU (unmasked (R,128) store) ----
    o = t2 + x
    a2 = alpha_ref[1]
    out_ref[...] = jnp.where(o >= 0, o, a2 * o)


def _full_spec(shape):
    nd = len(shape)
    return pl.BlockSpec(shape, lambda i: (0,) * nd)


def st_gcn_forward(x_nctv, A, params, *, matmul_dtype=jnp.float32):
    """x_nctv: (N, C, T, V) like PyTorch; A: (T, V, V). Returns (out_nctv, A).

    matmul_dtype: dtype of MXU operands (weights + activation casts).  Use
    jnp.bfloat16 on v6e/v7x for ~2x MXU throughput and half the weight VMEM;
    BN statistics, scale/shift, PReLU and the residual always stay in f32.
    """
    N, Cin, T, V = x_nctv.shape
    Cout = params['w_tcn'].shape[0]
    K = params['w_tcn'].shape[2]
    assert Cin == Cout, "identity-residual config requires in_channels == out_channels"
    VC = V * Cout
    R = T * N
    f32 = jnp.float32
    cdt = matmul_dtype

    # 2D lane-dense + sublane-full activations: row r = t*N + n, lane = v*C + c
    x2 = jnp.transpose(x_nctv.astype(f32), (2, 0, 3, 1)).reshape(R, V * Cin)

    A = A.astype(f32)
    wg = params['w_gcn'].astype(f32).T                            # (Cin, Cout)
    # stacked fused gcn weight: Wstack[t*VC + v*C + cin, w*C + cout] = A[t,v,w]*Wg[cin,cout]
    wstk = (A[:, :, None, :, None] * wg[None, None, :, None, :]) \
        .reshape(T * V * Cin, VC).astype(cdt)
    # gcn conv bias propagated through the graph contraction, expanded per row
    bgf = (A.sum(axis=1)[:, :, None] *
           params['b_gcn'].astype(f32)[None, None, :]).reshape(T, VC)
    bgf_rows = jnp.repeat(bgf, N, axis=0)                         # (R, VC)

    # lane-block selector for the fused gcn matmul: sel[r, t*VC:(t+1)*VC] = [t == r//N]
    sel = np.repeat(np.repeat(np.eye(T, dtype=np.float32), N, axis=0), VC, axis=1)
    sel = jnp.asarray(sel, dtype=cdt)                             # (R, T*VC)

    # per-tap block-diag-over-joints temporal weights (wcat split per tap)
    wt = jnp.transpose(params['w_tcn'].astype(f32), (2, 1, 0))    # (K, Cin, Cout)
    eyeV = jnp.eye(V, dtype=f32)
    wtaps = (eyeV[None, :, None, :, None] *
             wt[:, None, :, None, :]).reshape(K, VC, VC).astype(cdt)
    bt = jnp.tile(params['b_tcn'].astype(f32), V)[None, :]        # (1, VC)

    # temporal-tap row-validity masks (frames the zero padding would supply)
    P = (K - 1) // 2
    rows = np.arange(R)
    tmask = np.stack(
        [((rows + (k - P) * N >= 0) & (rows + (k - P) * N < R)).astype(np.float32)
         for k in range(K)], axis=0)[:, :, None]                  # (K, R, 1)
    tmask = jnp.asarray(tmask)

    bnp = jnp.stack([params['bn1_gamma'], params['bn1_beta'],
                     params['bn2_gamma'], params['bn2_beta']]).astype(f32)  # (4, C)
    alphas = jnp.array([params['prelu1_a'], params['prelu2_a']], f32)       # (2,)

    # lane <-> channel fold matrices (hoisted out of the kernel; lane l -> channel l % C)
    er_np = (np.arange(VC)[:, None] % Cout == np.arange(Cout)[None, :]).astype(np.float32)
    er = jnp.asarray(er_np)                                       # (VC, C)
    ee = jnp.asarray(er_np.T)                                     # (C, VC)

    vmem_args = (x2, sel, wstk, bgf_rows, wtaps, bt, tmask, bnp, er, ee)
    in_specs = [_full_spec(a.shape) for a in vmem_args] + \
               [pl.BlockSpec(memory_space=pltpu.MemorySpace.SMEM)]

    # VMEM budget derived from actual buffer sizes (double-buffered args) plus
    # headroom for in-kernel temporaries — don't assume v5e/v6e 128 MiB on v7x.
    arg_bytes = sum(int(a.size) * a.dtype.itemsize for a in vmem_args) + R * VC * 4
    vmem_limit = int(2 * arg_bytes + (8 << 20))

    out2 = pl.pallas_call(
        _st_gcn_kernel,
        grid=(1,),
        in_specs=in_specs,
        out_specs=pl.BlockSpec((R, VC), lambda i: (0, 0)),
        out_shape=jax.ShapeDtypeStruct((R, VC), f32),
        compiler_params=pltpu.CompilerParams(
            dimension_semantics=("arbitrary",),
            vmem_limit_bytes=vmem_limit),
    )(*vmem_args, alphas)

    out_nctv = jnp.transpose(out2.reshape(T, N, V, Cout), (1, 3, 0, 2))
    return out_nctv, A


def init_params(key, c_in, c_out, k_t):
    """Deterministic synthetic parameters (BN/PReLU use PyTorch init values)."""
    k1, k2, k3, k4 = jax.random.split(key, 4)
    return dict(
        w_gcn=0.2 * jax.random.normal(k1, (c_out, c_in), jnp.float32),
        b_gcn=0.1 * jax.random.normal(k2, (c_out,), jnp.float32),
        bn1_gamma=jnp.ones((c_out,), jnp.float32),
        bn1_beta=jnp.zeros((c_out,), jnp.float32),
        prelu1_a=0.25,
        w_tcn=0.2 * jax.random.normal(k3, (c_out, c_out, k_t), jnp.float32),
        b_tcn=0.1 * jax.random.normal(k4, (c_out,), jnp.float32),
        bn2_gamma=jnp.ones((c_out,), jnp.float32),
        bn2_beta=jnp.zeros((c_out,), jnp.float32),
        prelu2_a=0.25,
    )


def st_gcn_ref(x, A, params):
    """Pure-JAX reference of the PyTorch forward (training-mode BN, p=0 dropout)."""
    g1 = params['bn1_gamma'][None, :, None, None]
    b1 = params['bn1_beta'][None, :, None, None]
    g2 = params['bn2_gamma'][None, :, None, None]
    b2 = params['bn2_beta'][None, :, None, None]
    # gcn: 1x1 conv + einsum('nctv,tvw->nctw')
    y = jnp.einsum('nctv,dc->ndtv', x, params['w_gcn']) \
        + params['b_gcn'][None, :, None, None]
    y = jnp.einsum('nctv,tvw->nctw', y, A)
    # tcn: BN -> PReLU -> temporal conv -> BN -> Dropout(0)
    m = y.mean(axis=(0, 2, 3), keepdims=True)
    v = ((y - m) ** 2).mean(axis=(0, 2, 3), keepdims=True)
    y = (y - m) / jnp.sqrt(v + _EPS) * g1 + b1
    y = jnp.where(y >= 0, y, params['prelu1_a'] * y)
    K = params['w_tcn'].shape[2]
    P = (K - 1) // 2
    T = x.shape[2]
    yp = jnp.pad(y, ((0, 0), (0, 0), (P, P), (0, 0)))
    out = jnp.zeros((x.shape[0], params['w_tcn'].shape[0], T, x.shape[3]), jnp.float32)
    for k in range(K):
        out = out + jnp.einsum('nctv,dc->ndtv', yp[:, :, k:k + T],
                               params['w_tcn'][:, :, k])
    out = out + params['b_tcn'][None, :, None, None]
    m2 = out.mean(axis=(0, 2, 3), keepdims=True)
    v2 = ((out - m2) ** 2).mean(axis=(0, 2, 3), keepdims=True)
    out = (out - m2) / jnp.sqrt(v2 + _EPS) * g2 + b2
    out = out + x  # identity residual
    out = jnp.where(out >= 0, out, params['prelu2_a'] * out)
    return out, A


if __name__ == "__main__":
    key = jax.random.PRNGKey(0)
    kx, ka, kp = jax.random.split(key, 3)

    # st_gcn(in_channels=8, out_channels=8, kernel_size=(3, 16), stride=1)
    N, C, T, V, K_T = 2, 8, 8, 16, 3
    x = jax.random.normal(kx, (N, C, T, V), jnp.float32)
    A = jax.random.normal(ka, (T, V, V), jnp.float32)
    params = init_params(kp, C, C, K_T)

    ref, _ = st_gcn_ref(x, A, params)
    ref = np.asarray(ref)

    # f32 MXU operands: strict check
    out, A_out = st_gcn_forward(x, A, params)
    out = np.asarray(jax.block_until_ready(out))
    err = float(np.max(np.abs(out - ref)))
    assert np.allclose(out, ref, rtol=1e-2, atol=5e-2), err

    # bf16 MXU operands (v6e/v7x fast path; BN/residual stay f32): loose check
    out_bf, _ = st_gcn_forward(x, A, params, matmul_dtype=jnp.bfloat16)
    out_bf = np.asarray(jax.block_until_ready(out_bf))
    err_bf = float(np.max(np.abs(out_bf - ref)))
    assert err_bf < 0.25, err_bf

    print("KERNEL_OK")
</pallas_src>

<mosaic_0001>
module attributes {stable_mosaic.version = 11 : i64} {
  func.func @_st_gcn_kernel(%arg0: i32, %arg1: memref<16x128xf32, #tpu.memory_space<vmem>>, %arg2: memref<16x1024xf32, #tpu.memory_space<vmem>>, %arg3: memref<1024x128xf32, #tpu.memory_space<vmem>>, %arg4: memref<16x128xf32, #tpu.memory_space<vmem>>, %arg5: memref<3x128x128xf32, #tpu.memory_space<vmem>>, %arg6: memref<1x128xf32, #tpu.memory_space<vmem>>, %arg7: memref<3x16x1xf32, #tpu.memory_space<vmem>>, %arg8: memref<4x8xf32, #tpu.memory_space<vmem>>, %arg9: memref<128x8xf32, #tpu.memory_space<vmem>>, %arg10: memref<8x128xf32, #tpu.memory_space<vmem>>, %arg11: memref<2xf32, #tpu.memory_space<smem>>, %arg12: memref<16x128xf32, #tpu.memory_space<vmem>>) attributes {dimension_semantics = [#tpu.dimension_semantics<arbitrary>], iteration_bounds = array<i64: 1>, scalar_prefetch = 0 : i64, scratch_operands = 0 : i64, tpu.core_type = #tpu.core_type<tc>, window_params = [{pipeline_mode = #tpu.pipeline_mode<synchronous>, transform_indices = @transform_0, window_bounds = array<i64: 16, 128>}, {pipeline_mode = #tpu.pipeline_mode<synchronous>, transform_indices = @transform_1, window_bounds = array<i64: 16, 1024>}, {pipeline_mode = #tpu.pipeline_mode<synchronous>, transform_indices = @transform_2, window_bounds = array<i64: 1024, 128>}, {pipeline_mode = #tpu.pipeline_mode<synchronous>, transform_indices = @transform_3, window_bounds = array<i64: 16, 128>}, {pipeline_mode = #tpu.pipeline_mode<synchronous>, transform_indices = @transform_4, window_bounds = array<i64: 3, 128, 128>}, {pipeline_mode = #tpu.pipeline_mode<synchronous>, transform_indices = @transform_5, window_bounds = array<i64: 1, 128>}, {pipeline_mode = #tpu.pipeline_mode<synchronous>, transform_indices = @transform_6, window_bounds = array<i64: 3, 16, 1>}, {pipeline_mode = #tpu.pipeline_mode<synchronous>, transform_indices = @transform_7, window_bounds = array<i64: 4, 8>}, {pipeline_mode = #tpu.pipeline_mode<synchronous>, transform_indices = @transform_8, window_bounds = array<i64: 128, 8>}, {pipeline_mode = #tpu.pipeline_mode<synchronous>, transform_indices = @transform_9, window_bounds = array<i64: 8, 128>}, {transform_indices = @transform_10, window_bounds = array<i64: 2>}, {pipeline_mode = #tpu.pipeline_mode<synchronous>, transform_indices = @transform_11, window_bounds = array<i64: 16, 128>}]} {
    %c0 = arith.constant 0 : index
    %c0_0 = arith.constant 0 : index
    %0 = vector.load %arg1[%c0, %c0_0] : memref<16x128xf32, #tpu.memory_space<vmem>>, vector<16x128xf32>
    %1 = tpu.concatenate %0, %0, %0, %0, %0, %0, %0, %0 in 1 : vector<16x128xf32>, vector<16x128xf32>, vector<16x128xf32>, vector<16x128xf32>, vector<16x128xf32>, vector<16x128xf32>, vector<16x128xf32>, vector<16x128xf32> -> vector<16x1024xf32>
    %c0_1 = arith.constant 0 : index
    %c0_2 = arith.constant 0 : index
    %2 = vector.load %arg2[%c0_1, %c0_2] : memref<16x1024xf32, #tpu.memory_space<vmem>>, vector<16x1024xf32>
    %3 = arith.mulf %1, %2 : vector<16x1024xf32>
    %c0_3 = arith.constant 0 : index
    %c0_4 = arith.constant 0 : index
    %4 = vector.load %arg3[%c0_3, %c0_4] : memref<1024x128xf32, #tpu.memory_space<vmem>>, vector<1024x128xf32>
    %cst = arith.constant dense<0.000000e+00> : vector<16x128xf32>
    %5 = tpu.matmul %3, %4, %cst {dimension_numbers = #tpu.dot_dimension_numbers<[1], [0], [0], [1], [0, 0, 1, 1], [], []>} : vector<16x1024xf32>, vector<1024x128xf32>, vector<16x128xf32> -> vector<16x128xf32>
    %c0_5 = arith.constant 0 : index
    %c0_6 = arith.constant 0 : index
    %6 = vector.load %arg4[%c0_5, %c0_6] : memref<16x128xf32, #tpu.memory_space<vmem>>, vector<16x128xf32>
    %7 = arith.addf %5, %6 : vector<16x128xf32>
    %c0_7 = arith.constant 0 : index
    %c0_8 = arith.constant 0 : index
    %8 = vector.load %arg8[%c0_7, %c0_8] : memref<4x8xf32, #tpu.memory_space<vmem>>, vector<4x8xf32>
    %c0_9 = arith.constant 0 : index
    %c0_10 = arith.constant 0 : index
    %9 = vector.load %arg9[%c0_9, %c0_10] : memref<128x8xf32, #tpu.memory_space<vmem>>, vector<128x8xf32>
    %c0_11 = arith.constant 0 : index
    %c0_12 = arith.constant 0 : index
    %10 = vector.load %arg10[%c0_11, %c0_12] : memref<8x128xf32, #tpu.memory_space<vmem>>, vector<8x128xf32>
    %11 = vector.extract_strided_slice %8 {offsets = [0, 0], sizes = [1, 8], strides = [1, 1]} : vector<4x8xf32> to vector<1x8xf32>
    %12 = vector.extract_strided_slice %8 {offsets = [1, 0], sizes = [1, 8], strides = [1, 1]} : vector<4x8xf32> to vector<1x8xf32>
    %cst_13 = arith.constant dense<0.000000e+00> : vector<128xf32>
    %13 = vector.multi_reduction <add>, %7, %cst_13 [0] : vector<16x128xf32> to vector<128xf32>
    %14 = vector.shape_cast %13 : vector<128xf32> to vector<1x128xf32>
    %15 = arith.mulf %7, %7 : vector<16x128xf32>
    %cst_14 = arith.constant dense<0.000000e+00> : vector<128xf32>
    %16 = vector.multi_reduction <add>, %15, %cst_14 [0] : vector<16x128xf32> to vector<128xf32>
    %17 = vector.shape_cast %16 : vector<128xf32> to vector<1x128xf32>
    %cst_15 = arith.constant dense<0.000000e+00> : vector<1x8xf32>
    %18 = tpu.matmul %14, %9, %cst_15 {dimension_numbers = #tpu.dot_dimension_numbers<[1], [0], [0], [1], [0, 0, 1, 1], [], []>} : vector<1x128xf32>, vector<128x8xf32>, vector<1x8xf32> -> vector<1x8xf32>
    %cst_16 = arith.constant 3.906250e-03 : f32
    %19 = vector.broadcast %cst_16 : f32 to vector<1x8xf32>
    %20 = arith.mulf %18, %19 : vector<1x8xf32>
    %cst_17 = arith.constant dense<0.000000e+00> : vector<1x8xf32>
    %21 = tpu.matmul %17, %9, %cst_17 {dimension_numbers = #tpu.dot_dimension_numbers<[1], [0], [0], [1], [0, 0, 1, 1], [], []>} : vector<1x128xf32>, vector<128x8xf32>, vector<1x8xf32> -> vector<1x8xf32>
    %cst_18 = arith.constant 3.906250e-03 : f32
    %22 = vector.broadcast %cst_18 : f32 to vector<1x8xf32>
    %23 = arith.mulf %21, %22 : vector<1x8xf32>
    %24 = arith.mulf %20, %20 : vector<1x8xf32>
    %25 = arith.subf %23, %24 : vector<1x8xf32>
    %cst_19 = arith.constant 9.99999974E-6 : f32
    %26 = vector.broadcast %cst_19 : f32 to vector<1x8xf32>
    %27 = arith.addf %25, %26 : vector<1x8xf32>
    %28 = math.rsqrt %27 : vector<1x8xf32>
    %29 = arith.mulf %11, %28 : vector<1x8xf32>
    %30 = arith.mulf %20, %29 : vector<1x8xf32>
    %31 = arith.subf %12, %30 : vector<1x8xf32>
    %cst_20 = arith.constant dense<0.000000e+00> : vector<1x128xf32>
    %32 = tpu.matmul %29, %10, %cst_20 {dimension_numbers = #tpu.dot_dimension_numbers<[1], [0], [0], [1], [0, 0, 1, 1], [], []>} : vector<1x8xf32>, vector<8x128xf32>, vector<1x128xf32> -> vector<1x128xf32>
    %cst_21 = arith.constant dense<0.000000e+00> : vector<1x128xf32>
    %33 = tpu.matmul %31, %10, %cst_21 {dimension_numbers = #tpu.dot_dimension_numbers<[1], [0], [0], [1], [0, 0, 1, 1], [], []>} : vector<1x8xf32>, vector<8x128xf32>, vector<1x128xf32> -> vector<1x128xf32>
    %34 = vector.broadcast %32 : vector<1x128xf32> to vector<16x128xf32>
    %35 = arith.mulf %7, %34 : vector<16x128xf32>
    %36 = vector.broadcast %33 : vector<1x128xf32> to vector<16x128xf32>
    %37 = arith.addf %35, %36 : vector<16x128xf32>
    %c0_22 = arith.constant 0 : index
    %38 = memref.load %arg11[%c0_22] : memref<2xf32, #tpu.memory_space<smem>>
    %cst_23 = arith.constant 0.000000e+00 : f32
    %39 = vector.broadcast %cst_23 : f32 to vector<16x128xf32>
    %40 = arith.cmpf oge, %37, %39 : vector<16x128xf32>
    %41 = vector.broadcast %38 : f32 to vector<16x128xf32>
    %42 = arith.mulf %41, %37 : vector<16x128xf32>
    %43 = arith.select %40, %37, %42 : vector<16x128xi1>, vector<16x128xf32>
    %c1 = arith.constant 1 : index
    %c0_24 = arith.constant 0 : index
    %c0_25 = arith.constant 0 : index
    %44 = vector.load %arg5[%c1, %c0_24, %c0_25] : memref<3x128x128xf32, #tpu.memory_space<vmem>>, vector<1x128x128xf32>
    %45 = vector.shape_cast %44 : vector<1x128x128xf32> to vector<128x128xf32>
    %cst_26 = arith.constant dense<0.000000e+00> : vector<16x128xf32>
    %46 = tpu.matmul %43, %45, %cst_26 {dimension_numbers = #tpu.dot_dimension_numbers<[1], [0], [0], [1], [0, 0, 1, 1], [], []>} : vector<16x128xf32>, vector<128x128xf32>, vector<16x128xf32> -> vector<16x128xf32>
    %c2_i32 = arith.constant 2 : i32
    %47 = tpu.dynamic_rotate %43 by %c2_i32 dim 0 : vector<16x128xf32>, i32 -> vector<16x128xf32>
    %c0_27 = arith.constant 0 : index
    %c0_28 = arith.constant 0 : index
    %c0_29 = arith.constant 0 : index
    %48 = vector.load %arg7[%c0_27, %c0_28, %c0_29] : memref<3x16x1xf32, #tpu.memory_space<vmem>>, vector<1x16x1xf32>
    %49 = vector.shape_cast %48 : vector<1x16x1xf32> to vector<16x1xf32>
    %50 = vector.broadcast %49 : vector<16x1xf32> to vector<16x128xf32>
    %51 = arith.mulf %47, %50 : vector<16x128xf32>
    %c0_30 = arith.constant 0 : index
    %c0_31 = arith.constant 0 : index
    %c0_32 = arith.constant 0 : index
    %52 = vector.load %arg5[%c0_30, %c0_31, %c0_32] : memref<3x128x128xf32, #tpu.memory_space<vmem>>, vector<1x128x128xf32>
    %53 = vector.shape_cast %52 : vector<1x128x128xf32> to vector<128x128xf32>
    %cst_33 = arith.constant dense<0.000000e+00> : vector<16x128xf32>
    %54 = tpu.matmul %51, %53, %cst_33 {dimension_numbers = #tpu.dot_dimension_numbers<[1], [0], [0], [1], [0, 0, 1, 1], [], []>} : vector<16x128xf32>, vector<128x128xf32>, vector<16x128xf32> -> vector<16x128xf32>
    %55 = arith.addf %46, %54 : vector<16x128xf32>
    %c14_i32 = arith.constant 14 : i32
    %56 = tpu.dynamic_rotate %43 by %c14_i32 dim 0 : vector<16x128xf32>, i32 -> vector<16x128xf32>
    %c2 = arith.constant 2 : index
    %c0_34 = arith.constant 0 : index
    %c0_35 = arith.constant 0 : index
    %57 = vector.load %arg7[%c2, %c0_34, %c0_35] : memref<3x16x1xf32, #tpu.memory_space<vmem>>, vector<1x16x1xf32>
    %58 = vector.shape_cast %57 : vector<1x16x1xf32> to vector<16x1xf32>
    %59 = vector.broadcast %58 : vector<16x1xf32> to vector<16x128xf32>
    %60 = arith.mulf %56, %59 : vector<16x128xf32>
    %c2_36 = arith.constant 2 : index
    %c0_37 = arith.constant 0 : index
    %c0_38 = arith.constant 0 : index
    %61 = vector.load %arg5[%c2_36, %c0_37, %c0_38] : memref<3x128x128xf32, #tpu.memory_space<vmem>>, vector<1x128x128xf32>
    %62 = vector.shape_cast %61 : vector<1x128x128xf32> to vector<128x128xf32>
    %cst_39 = arith.constant dense<0.000000e+00> : vector<16x128xf32>
    %63 = tpu.matmul %60, %62, %cst_39 {dimension_numbers = #tpu.dot_dimension_numbers<[1], [0], [0], [1], [0, 0, 1, 1], [], []>} : vector<16x128xf32>, vector<128x128xf32>, vector<16x128xf32> -> vector<16x128xf32>
    %64 = arith.addf %55, %63 : vector<16x128xf32>
    %c0_40 = arith.constant 0 : index
    %c0_41 = arith.constant 0 : index
    %65 = vector.load %arg6[%c0_40, %c0_41] : memref<1x128xf32, #tpu.memory_space<vmem>>, vector<1x128xf32>
    %66 = vector.broadcast %65 : vector<1x128xf32> to vector<16x128xf32>
    %67 = arith.addf %64, %66 : vector<16x128xf32>
    %68 = vector.extract_strided_slice %8 {offsets = [2, 0], sizes = [1, 8], strides = [1, 1]} : vector<4x8xf32> to vector<1x8xf32>
    %69 = vector.extract_strided_slice %8 {offsets = [3, 0], sizes = [1, 8], strides = [1, 1]} : vector<4x8xf32> to vector<1x8xf32>
    %cst_42 = arith.constant dense<0.000000e+00> : vector<128xf32>
    %70 = vector.multi_reduction <add>, %67, %cst_42 [0] : vector<16x128xf32> to vector<128xf32>
    %71 = vector.shape_cast %70 : vector<128xf32> to vector<1x128xf32>
    %72 = arith.mulf %67, %67 : vector<16x128xf32>
    %cst_43 = arith.constant dense<0.000000e+00> : vector<128xf32>
    %73 = vector.multi_reduction <add>, %72, %cst_43 [0] : vector<16x128xf32> to vector<128xf32>
    %74 = vector.shape_cast %73 : vector<128xf32> to vector<1x128xf32>
    %cst_44 = arith.constant dense<0.000000e+00> : vector<1x8xf32>
    %75 = tpu.matmul %71, %9, %cst_44 {dimension_numbers = #tpu.dot_dimension_numbers<[1], [0], [0], [1], [0, 0, 1, 1], [], []>} : vector<1x128xf32>, vector<128x8xf32>, vector<1x8xf32> -> vector<1x8xf32>
    %cst_45 = arith.constant 3.906250e-03 : f32
    %76 = vector.broadcast %cst_45 : f32 to vector<1x8xf32>
    %77 = arith.mulf %75, %76 : vector<1x8xf32>
    %cst_46 = arith.constant dense<0.000000e+00> : vector<1x8xf32>
    %78 = tpu.matmul %74, %9, %cst_46 {dimension_numbers = #tpu.dot_dimension_numbers<[1], [0], [0], [1], [0, 0, 1, 1], [], []>} : vector<1x128xf32>, vector<128x8xf32>, vector<1x8xf32> -> vector<1x8xf32>
    %cst_47 = arith.constant 3.906250e-03 : f32
    %79 = vector.broadcast %cst_47 : f32 to vector<1x8xf32>
    %80 = arith.mulf %78, %79 : vector<1x8xf32>
    %81 = arith.mulf %77, %77 : vector<1x8xf32>
    %82 = arith.subf %80, %81 : vector<1x8xf32>
    %cst_48 = arith.constant 9.99999974E-6 : f32
    %83 = vector.broadcast %cst_48 : f32 to vector<1x8xf32>
    %84 = arith.addf %82, %83 : vector<1x8xf32>
    %85 = math.rsqrt %84 : vector<1x8xf32>
    %86 = arith.mulf %68, %85 : vector<1x8xf32>
    %87 = arith.mulf %77, %86 : vector<1x8xf32>
    %88 = arith.subf %69, %87 : vector<1x8xf32>
    %cst_49 = arith.constant dense<0.000000e+00> : vector<1x128xf32>
    %89 = tpu.matmul %86, %10, %cst_49 {dimension_numbers = #tpu.dot_dimension_numbers<[1], [0], [0], [1], [0, 0, 1, 1], [], []>} : vector<1x8xf32>, vector<8x128xf32>, vector<1x128xf32> -> vector<1x128xf32>
    %cst_50 = arith.constant dense<0.000000e+00> : vector<1x128xf32>
    %90 = tpu.matmul %88, %10, %cst_50 {dimension_numbers = #tpu.dot_dimension_numbers<[1], [0], [0], [1], [0, 0, 1, 1], [], []>} : vector<1x8xf32>, vector<8x128xf32>, vector<1x128xf32> -> vector<1x128xf32>
    %91 = vector.broadcast %89 : vector<1x128xf32> to vector<16x128xf32>
    %92 = arith.mulf %67, %91 : vector<16x128xf32>
    %93 = vector.broadcast %90 : vector<1x128xf32> to vector<16x128xf32>
    %94 = arith.addf %92, %93 : vector<16x128xf32>
    %95 = arith.addf %94, %0 : vector<16x128xf32>
    %c1_51 = arith.constant 1 : index
    %96 = memref.load %arg11[%c1_51] : memref<2xf32, #tpu.memory_space<smem>>
    %cst_52 = arith.constant 0.000000e+00 : f32
    %97 = vector.broadcast %cst_52 : f32 to vector<16x128xf32>
    %98 = arith.cmpf oge, %95, %97 : vector<16x128xf32>
    %99 = vector.broadcast %96 : f32 to vector<16x128xf32>
    %100 = arith.mulf %99, %95 : vector<16x128xf32>
    %101 = arith.select %98, %95, %100 : vector<16x128xi1>, vector<16x128xf32>
    %c0_53 = arith.constant 0 : index
    %c0_54 = arith.constant 0 : index
    %102 = vector.load %arg12[%c0_53, %c0_54] : memref<16x128xf32, #tpu.memory_space<vmem>>, vector<16x128xf32>
    tpu.vector_store %arg12[%c0_53, %c0_54], %101 {strides = array<i32>} : memref<16x128xf32, #tpu.memory_space<vmem>>, vector<16x128xf32>,
    return
  }
  func.func @transform_0(%arg0: i32) -> (i32, i32) {
    %c0_i32 = arith.constant 0 : i32
    %c0_i32_0 = arith.constant 0 : i32
    %c0_i32_1 = arith.constant 0 : i32
    return %c0_i32, %c0_i32_0 : i32, i32
  }
  func.func @transform_1(%arg0: i32) -> (i32, i32) {
    %c0_i32 = arith.constant 0 : i32
    %c0_i32_0 = arith.constant 0 : i32
    %c0_i32_1 = arith.constant 0 : i32
    return %c0_i32, %c0_i32_0 : i32, i32
  }
  func.func @transform_2(%arg0: i32) -> (i32, i32) {
    %c0_i32 = arith.constant 0 : i32
    %c0_i32_0 = arith.constant 0 : i32
    %c0_i32_1 = arith.constant 0 : i32
    return %c0_i32, %c0_i32_0 : i32, i32
  }
  func.func @transform_3(%arg0: i32) -> (i32, i32) {
    %c0_i32 = arith.constant 0 : i32
    %c0_i32_0 = arith.constant 0 : i32
    %c0_i32_1 = arith.constant 0 : i32
    return %c0_i32, %c0_i32_0 : i32, i32
  }
  func.func @transform_4(%arg0: i32) -> (i32, i32, i32) {
    %c0_i32 = arith.constant 0 : i32
    %c0_i32_0 = arith.constant 0 : i32
    %c0_i32_1 = arith.constant 0 : i32
    %c0_i32_2 = arith.constant 0 : i32
    return %c0_i32, %c0_i32_0, %c0_i32_1 : i32, i32, i32
  }
  func.func @transform_5(%arg0: i32) -> (i32, i32) {
    %c0_i32 = arith.constant 0 : i32
    %c0_i32_0 = arith.constant 0 : i32
    %c0_i32_1 = arith.constant 0 : i32
    return %c0_i32, %c0_i32_0 : i32, i32
  }
  func.func @transform_6(%arg0: i32) -> (i32, i32, i32) {
    %c0_i32 = arith.constant 0 : i32
    %c0_i32_0 = arith.constant 0 : i32
    %c0_i32_1 = arith.constant 0 : i32
    %c0_i32_2 = arith.constant 0 : i32
    return %c0_i32, %c0_i32_0, %c0_i32_1 : i32, i32, i32
  }
  func.func @transform_7(%arg0: i32) -> (i32, i32) {
    %c0_i32 = arith.constant 0 : i32
    %c0_i32_0 = arith.constant 0 : i32
    %c0_i32_1 = arith.constant 0 : i32
    return %c0_i32, %c0_i32_0 : i32, i32
  }
  func.func @transform_8(%arg0: i32) -> (i32, i32) {
    %c0_i32 = arith.constant 0 : i32
    %c0_i32_0 = arith.constant 0 : i32
    %c0_i32_1 = arith.constant 0 : i32
    return %c0_i32, %c0_i32_0 : i32, i32
  }
  func.func @transform_9(%arg0: i32) -> (i32, i32) {
    %c0_i32 = arith.constant 0 : i32
    %c0_i32_0 = arith.constant 0 : i32
    %c0_i32_1 = arith.constant 0 : i32
    return %c0_i32, %c0_i32_0 : i32, i32
  }
  func.func @transform_10(%arg0: i32) -> i32 {
    %c0_i32 = arith.constant 0 : i32
    %c0_i32_0 = arith.constant 0 : i32
    return %c0_i32 : i32
  }
  func.func @transform_11(%arg0: i32) -> (i32, i32) {
    %c0_i32 = arith.constant 0 : i32
    %c0_i32_0 = arith.constant 0 : i32
    %c0_i32_1 = arith.constant 0 : i32
    return %c0_i32, %c0_i32_0 : i32, i32
  }
}

</mosaic_0001>

<bundles_post_ra>
// kernel: tpu_custom_call.1
= control target key start
LH: loop header
LB: loop body
LE: loop exit
PB: predicated region body
PF: predicated region fallthrough
CT: control target
= control target key end

     0   :  { %16 = vsyncpa [#allocation3], 0  ;;  %s2726_s0 = inlined_call_operand.vmem [shape: f32[16,128], index: 0, kind: input, shape index: {}]   ;;  %s2727_s1 = inlined_call_operand.vmem [shape: f32[16,1024], index: 1, kind: input, shape index: {}]   ;;  %s2728_s2 = inlined_call_operand.hbm [shape: f32[1024,128], index: 2, kind: input, shape index: {}]   ;;  %s2729_s3 = inlined_call_operand.vmem [shape: f32[16,128], index: 3, kind: input, shape index: {}]   ;;  %s2730_s4 = inlined_call_operand.hbm [shape: f32[3,128,128], index: 4, kind: input, shape index: {}]   ;;  %s2731_s5 = inlined_call_operand.vmem [shape: f32[1,128], index: 5, kind: input, shape index: {}]   ;;  %s2732_s6 = inlined_call_operand.vmem [shape: f32[3,16,1], index: 6, kind: input, shape index: {}]   ;;  %s2733_s7 = inlined_call_operand.vmem [shape: f32[4,8], index: 7, kind: input, shape index: {}]   ;;  %s2734_s8 = inlined_call_operand.vmem [shape: f32[128,8], index: 8, kind: input, shape index: {}]   ;;  %s2735_s9 = inlined_call_operand.vmem [shape: f32[8,128], index: 9, kind: input, shape index: {}]   ;;  %s2736_s10 = inlined_call_operand.vmem [shape: f32[2], index: 10, kind: input, shape index: {}]   ;;  %s2737_s11 = inlined_call_operand.hbm [shape: f32[16,128], index: 11, kind: output, shape index: {}]  }
   0x1   :  { %17 = vsyncpa [#allocation7], 0 }
   0x2   :  { %18 = vsyncpa [#allocation5], 0 }
   0x3   :  { %19 = vsyncpa [#allocation4], 0  ;;  %s2240_s17 = smov [#allocation2]  }
   0x4   :  { %s29_s18 = sshll.u32 %s2240_s17, 4  ;;  %s30_s18 = int_to_ptr.vmem [resolvable:$true] %s29_s18 }
   0x5   :  { %s2168_s19 = scalar_lea.vmem %s30_s18, 16384  ;;  %p2173_p1 = scmp.lt.s32.totalorder %s30_s18, %s30_s18 }
   0x6   :  { %p2169_p0 = scmp.ne.s32.totalorder %s30_s18, %s2168_s19  ;;  %p2174_p2 = scmp.lt.s32.totalorder %s2168_s19, %s2168_s19 }
   0x8   :  { %p2175_p3 = por %p2174_p2, %p2173_p1 }
   0xa   :  { %p2176_p4 = pnand %p2175_p3, %p2169_p0 }
   0xc   :  { %2179 = shalt.err (!%p2176_p4)
}
   0xd   :  { %s2241_s20 = smov 128   ;;  %s2242_s21 = smov 8  }
   0xe   :  { %35 = dma.hbm_to_vmem [thread:$0]  %s2728_s2, 16384, %s30_s18, [#allocation3], %s2241_s20, %s2241_s20, %s2242_s21  }
   0xf   :  { %s2243_s24 = smov [#allocation6]   ;;  %s66_s28 = sshll.u32 %s2736_s10, 4  ;;  %s67_s28 = int_to_ptr.vmem [resolvable:$true] %s66_s28 }
  0x10   :  { %s43_s25 = sshll.u32 %s2243_s24, 4  ;;  %s44_s25 = int_to_ptr.vmem [resolvable:$true] %s43_s25 }
  0x11   :  { %s2188_s29 = scalar_lea.vmem %s44_s25, 6144  ;;  %p2193_p6 = scmp.lt.s32.totalorder %s44_s25, %s44_s25 }
  0x12   :  { %p2189_p5 = scmp.ne.s32.totalorder %s44_s25, %s2188_s29  ;;  %p2194_p7 = scmp.lt.s32.totalorder %s2188_s29, %s2188_s29 }
  0x14   :  { %p2195_p8 = por %p2194_p7, %p2193_p6 }
  0x16   :  { %p2196_p9 = pnand %p2195_p8, %p2189_p5 }
  0x18   :  { %2199 = shalt.err (!%p2196_p9)
}
  0x19   :  { %49 = dma.hbm_to_vmem [thread:$0]  %s2730_s4, 6144, %s44_s25, [#allocation7], %s2241_s20, %s2241_s20, %s2242_s21  }
  0x1a   :  { %s2200_s12 = scalar_lea.vmem %s67_s28, 16  ;;  %p2205_p11 = scmp.lt.s32.totalorder %s67_s28, %s67_s28 }
  0x1b   :  { %p2201_p10 = scmp.ne.s32.totalorder %s67_s28, %s2200_s12  ;;  %p2206_p12 = scmp.lt.s32.totalorder %s2200_s12, %s2200_s12 }
  0x1d   :  { %p2207_p13 = por %p2206_p12, %p2205_p11 }
  0x1f   :  { %p2208_p0 = pnand %p2207_p13, %p2201_p10 }
  0x21   :  { %2211 = shalt.err (!%p2208_p0)
}
  0x22   :  { %s2244_s10 = smov [#allocation8]  }
  0x23   :  { %69 = dma.vmem_to_smem %s67_s28, 16, %s2244_s10, [#allocation5]  }
  0x24   :  { %2232 = dma.done.wait [#allocation3], 16384  }
  0x25   :  { %2233 = vsyncadd [#allocation3], 4294950912 }
  0x26   :  { %2234 = dma.done.wait [#allocation7], 6144  }
  0x27   :  { %2235 = vsyncadd [#allocation7], 4294961152 }
  0x28   :  { %2236 = dma.done.wait [#allocation5], 16  }
  0x29   :  { %2237 = vsyncadd [#allocation5], 4294967280 }
  0x2a   :  { %79 = sfence }
  0x2b   :  { %v145_v0 = vld [vmem:[#allocation2 + $0xf8] sm:$0xff]  ;;  %v144_v4 = vld [vmem:[#allocation2 + $0xf0] sm:$0xff]  ;;  %v143_v8 = vld [vmem:[#allocation2 + $0xe8] sm:$0xff]  ;;  %vm2246_vm0 = vmmov 0   ;;  %vm730_vm1 = vcmask 64512   ;;  %s2248_s15 = smov [#allocation9]  }
  0x2c   :  { %v177_v1 = vld [vmem:[#allocation2 + $0x1f8] sm:$0xff]  ;;  %1596 = vmatprep.subr.mxu0 %v145_v0  ;;  %v176_v5 = vld [vmem:[#allocation2 + $0x1f0] sm:$0xff]  ;;  %v175_v9 = vld [vmem:[#allocation2 + $0x1e8] sm:$0xff]  ;;  %s1574_s16 = sshll.u32 %s2248_s15, 4  ;;  %s1575_s16 = int_to_ptr.vmem [resolvable:$true] %s1574_s16 }
  0x2d   :  { %v129_v2 = vld [vmem:[#allocation2 + $0x78] sm:$0xff]  ;;  %1634 = vmatprep.subr.mxu1 %v177_v1  ;;  %v128_v6 = vld [vmem:[#allocation2 + $0x70] sm:$0xff]  ;;  %v127_v10 = vld [vmem:[#allocation2 + $0x68] sm:$0xff]  ;;  %s2212_s17 = scalar_lea.vmem %s1575_s16, 256  ;;  %p2217_p2 = scmp.lt.s32.totalorder %s1575_s16, %s1575_s16 }
  0x2e   :  { %v161_v3 = vld [vmem:[#allocation2 + $0x178] sm:$0xff]  ;;  %1597 = vmatpush3.msra.mxu0 %v129_v2  ;;  %v160_v7 = vld [vmem:[#allocation2 + $0x170] sm:$0xff]  ;;  %v159_v11 = vld [vmem:[#allocation2 + $0x168] sm:$0xff]  ;;  %p2213_p1 = scmp.ne.s32.totalorder %s1575_s16, %s2212_s17  ;;  %p2218_p3 = scmp.lt.s32.totalorder %s2212_s17, %s2212_s17 }
  0x2f   :  { %1635 = vmatpush3.msra.mxu1 %v161_v3  ;;  %1598 = vmatprep.subr.mxu0 %v144_v4  ;;  %v142_v12 = vld [vmem:[#allocation2 + $0xe0] sm:$0xff]  ;;  %v141_v16 = vld [vmem:[#allocation2 + $0xd8] sm:$0xff]  ;;  %v140_v20 = vld [vmem:[#allocation2 + $0xd0] sm:$0xff] }
  0x30   :  { %1636 = vmatprep.subr.mxu1 %v176_v5  ;;  %1599 = vmatpush3.msra.mxu0 %v128_v6  ;;  %v174_v13 = vld [vmem:[#allocation2 + $0x1e0] sm:$0xff]  ;;  %v173_v17 = vld [vmem:[#allocation2 + $0x1d8] sm:$0xff]  ;;  %v172_v21 = vld [vmem:[#allocation2 + $0x1d0] sm:$0xff]  ;;  %p2219_p4 = por %p2218_p3, %p2217_p2 }
  0x31   :  { %1637 = vmatpush3.msra.mxu1 %v160_v7  ;;  %1600 = vmatprep.subr.mxu0 %v143_v8  ;;  %v126_v14 = vld [vmem:[#allocation2 + $0x60] sm:$0xff]  ;;  %v125_v18 = vld [vmem:[#allocation2 + $0x58] sm:$0xff]  ;;  %v124_v22 = vld [vmem:[#allocation2 + $0x50] sm:$0xff] }
  0x32   :  { %1638 = vmatprep.subr.mxu1 %v175_v9  ;;  %v158_v15 = vld [vmem:[#allocation2 + $0x160] sm:$0xff]  ;;  %1601 = vmatpush3.msra.mxu0 %v127_v10  ;;  %v157_v19 = vld [vmem:[#allocation2 + $0x158] sm:$0xff]  ;;  %v156_v23 = vld [vmem:[#allocation2 + $0x150] sm:$0xff]  ;;  %p2220_p5 = pnand %p2219_p4, %p2213_p1 }
  0x33   :  { %1639 = vmatpush3.msra.mxu1 %v159_v11  ;;  %1602 = vmatprep.subr.mxu0 %v142_v12  ;;  %v139_v24 = vld [vmem:[#allocation2 + $0xc8] sm:$0xff]  ;;  %v138_v28 = vld [vmem:[#allocation2 + $0xc0] sm:$0xff]  ;;  %v137_v32 = vld [vmem:[#allocation2 + $0xb8] sm:$0xff] }
  0x34   :  { %1640 = vmatprep.subr.mxu1 %v174_v13  ;;  %1603 = vmatpush3.msra.mxu0 %v126_v14  ;;  %v171_v25 = vld [vmem:[#allocation2 + $0x1c8] sm:$0xff]  ;;  %v170_v29 = vld [vmem:[#allocation2 + $0x1c0] sm:$0xff]  ;;  %v169_v33 = vld [vmem:[#allocation2 + $0x1b8] sm:$0xff] }
  0x35   :  { %1641 = vmatpush3.msra.mxu1 %v158_v15  ;;  %1604 = vmatprep.subr.mxu0 %v141_v16  ;;  %v123_v26 = vld [vmem:[#allocation2 + $0x48] sm:$0xff]  ;;  %v122_v30 = vld [vmem:[#allocation2 + $0x40] sm:$0xff]  ;;  %v121_v34 = vld [vmem:[#allocation2 + $0x38] sm:$0xff] }
  0x36   :  { %1642 = vmatprep.subr.mxu1 %v173_v17  ;;  %1605 = vmatpush3.msra.mxu0 %v125_v18  ;;  %v155_v27 = vld [vmem:[#allocation2 + $0x148] sm:$0xff]  ;;  %v154_v31 = vld [vmem:[#allocation2 + $0x140] sm:$0xff]  ;;  %v153_v35 = vld [vmem:[#allocation2 + $0x138] sm:$0xff] }
  0x37   :  { %1643 = vmatpush3.msra.mxu1 %v157_v19  ;;  %1606 = vmatprep.subr.mxu0 %v140_v20  ;;  %v136_v36 = vld [vmem:[#allocation2 + $0xb0] sm:$0xff]  ;;  %v135_v40 = vld [vmem:[#allocation2 + $0xa8] sm:$0xff]  ;;  %v134_v44 = vld [vmem:[#allocation2 + $0xa0] sm:$0xff] }
  0x38   :  { %1644 = vmatprep.subr.mxu1 %v172_v21  ;;  %1607 = vmatpush3.msra.mxu0 %v124_v22  ;;  %v168_v37 = vld [vmem:[#allocation2 + $0x1b0] sm:$0xff]  ;;  %v167_v41 = vld [vmem:[#allocation2 + $0x1a8] sm:$0xff]  ;;  %v166_v45 = vld [vmem:[#allocation2 + $0x1a0] sm:$0xff] }
  0x39   :  { %1645 = vmatpush3.msra.mxu1 %v156_v23  ;;  %1608 = vmatprep.subr.mxu0 %v139_v24  ;;  %v120_v38 = vld [vmem:[#allocation2 + $0x30] sm:$0xff]  ;;  %v119_v42 = vld [vmem:[#allocation2 + $0x28] sm:$0xff]  ;;  %v118_v46 = vld [vmem:[#allocation2 + $0x20] sm:$0xff] }
  0x3a   :  { %1646 = vmatprep.subr.mxu1 %v171_v25  ;;  %1609 = vmatpush3.msra.mxu0 %v123_v26  ;;  %v152_v39 = vld [vmem:[#allocation2 + $0x130] sm:$0xff]  ;;  %v151_v43 = vld [vmem:[#allocation2 + $0x128] sm:$0xff]  ;;  %v150_v47 = vld [vmem:[#allocation2 + $0x120] sm:$0xff] }
  0x3b   :  { %1647 = vmatpush3.msra.mxu1 %v155_v27  ;;  %1610 = vmatprep.subr.mxu0 %v138_v28  ;;  %v133_v48 = vld [vmem:[#allocation2 + $0x98] sm:$0xff]  ;;  %v132_v52 = vld [vmem:[#allocation2 + $0x90] sm:$0xff]  ;;  %v2327_v56 = vld [vmem:[%s2726_s0] sm:$0xff] }
  0x3c   :  { %1648 = vmatprep.subr.mxu1 %v170_v29  ;;  %1611 = vmatpush3.msra.mxu0 %v122_v30  ;;  %v165_v49 = vld [vmem:[#allocation2 + $0x198] sm:$0xff]  ;;  %v164_v53 = vld [vmem:[#allocation2 + $0x190] sm:$0xff]  ;;  %v83_v57 = vld [vmem:[%s2727_s1 + $0x8] sm:$0xff] }
  0x3d   :  { %1649 = vmatpush3.msra.mxu1 %v154_v31  ;;  %1612 = vmatprep.subr.mxu0 %v137_v32  ;;  %v117_v50 = vld [vmem:[#allocation2 + $0x18] sm:$0xff]  ;;  %v116_v54 = vld [vmem:[#allocation2 + $0x10] sm:$0xff]  ;;  %v131_v58 = vld [vmem:[#allocation2 + $0x88] sm:$0xff]  ;;  %v99_v2 = vmul.f32 %v83_v57, %v2327_v56 }
  0x3e   :  { %1650 = vmatprep.subr.mxu1 %v169_v33  ;;  %1613 = vmatpush3.msra.mxu0 %v121_v34  ;;  %v149_v51 = vld [vmem:[#allocation2 + $0x118] sm:$0xff]  ;;  %v148_v55 = vld [vmem:[#allocation2 + $0x110] sm:$0xff]  ;;  %v163_v59 = vld [vmem:[#allocation2 + $0x188] sm:$0xff] }
  0x3f   :  { %1651 = vmatpush3.msra.mxu1 %v153_v35  ;;  %1614 = vmatprep.subr.mxu0 %v136_v36  ;;  %v82_v60 = vld [vmem:[%s2727_s1] sm:$0xff]  ;;  %v115_v61 = vld [vmem:[#allocation2 + $0x8] sm:$0xff]  ;;  %v85_v63 = vld [vmem:[%s2727_s1 + $0x18] sm:$0xff] }
  0x40   :  { %1652 = vmatprep.subr.mxu1 %v168_v37  ;;  %1615 = vmatpush3.msra.mxu0 %v120_v38  ;;  %v147_v62 = vld [vmem:[#allocation2 + $0x108] sm:$0xff]  ;;  %v130_v0 = vld [vmem:[#allocation2 + $0x80] sm:$0xff]  ;;  %v84_v3 = vld [vmem:[%s2727_s1 + $0x10] sm:$0xff]  ;;  %v98_v5 = vmul.f32 %v82_v60, %v2327_v56  ;;  %v101_v7 = vmul.f32 %v85_v63, %v2327_v56 }
  0x41   :  { %1653 = vmatpush3.msra.mxu1 %v152_v39  ;;  %1616 = vmatprep.subr.mxu0 %v135_v40  ;;  %v162_v1 = vld [vmem:[#allocation2 + $0x180] sm:$0xff]  ;;  %v209_v8 = vld [vmem:[#allocation2 + $0x2f8] sm:$0xff]  ;;  %v100_v9 = vmul.f32 %v84_v3, %v2327_v56  ;;  %v208_v13 = vld [vmem:[#allocation2 + $0x2f0] sm:$0xff] }
  0x42   :  { %1654 = vmatprep.subr.mxu1 %v167_v41  ;;  %1617 = vmatpush3.msra.mxu0 %v119_v42  ;;  %v114_v4 = vld [vmem:[#allocation2] sm:$0xff]  ;;  %v241_v10 = vld [vmem:[#allocation2 + $0x3f8] sm:$0xff]  ;;  %v240_v14 = vld [vmem:[#allocation2 + $0x3f0] sm:$0xff] }
  0x43   :  { %1655 = vmatpush3.msra.mxu1 %v151_v43  ;;  %1618 = vmatprep.subr.mxu0 %v134_v44  ;;  %v146_v6 = vld [vmem:[#allocation2 + $0x100] sm:$0xff]  ;;  %v193_v11 = vld [vmem:[#allocation2 + $0x278] sm:$0xff]  ;;  %v192_v15 = vld [vmem:[#allocation2 + $0x270] sm:$0xff] }
  0x44   :  { %1656 = vmatprep.subr.mxu1 %v166_v45  ;;  %1619 = vmatpush3.msra.mxu0 %v118_v46  ;;  %v225_v12 = vld [vmem:[#allocation2 + $0x378] sm:$0xff]  ;;  %v224_v16 = vld [vmem:[#allocation2 + $0x370] sm:$0xff]  ;;  %v207_v17 = vld [vmem:[#allocation2 + $0x2e8] sm:$0xff] }
  0x45   :  { %1657 = vmatpush3.msra.mxu1 %v150_v47  ;;  %1620 = vmatprep.subr.mxu0 %v133_v48  ;;  %v239_v18 = vld [vmem:[#allocation2 + $0x3e8] sm:$0xff]  ;;  %v206_v21 = vld [vmem:[#allocation2 + $0x2e0] sm:$0xff]  ;;  %v205_v25 = vld [vmem:[#allocation2 + $0x2d8] sm:$0xff] }
  0x46   :  { %1658 = vmatprep.subr.mxu1 %v165_v49  ;;  %1621 = vmatpush3.msra.mxu0 %v117_v50  ;;  %v191_v19 = vld [vmem:[#allocation2 + $0x268] sm:$0xff]  ;;  %v238_v22 = vld [vmem:[#allocation2 + $0x3e0] sm:$0xff]  ;;  %v237_v26 = vld [vmem:[#allocation2 + $0x3d8] sm:$0xff] }
  0x47   :  { %1659 = vmatpush3.msra.mxu1 %v149_v51  ;;  %1622 = vmatprep.subr.mxu0 %v132_v52  ;;  %v223_v20 = vld [vmem:[#allocation2 + $0x368] sm:$0xff]  ;;  %v190_v23 = vld [vmem:[#allocation2 + $0x260] sm:$0xff]  ;;  %v189_v27 = vld [vmem:[#allocation2 + $0x258] sm:$0xff] }
  0x48   :  { %1660 = vmatprep.subr.mxu1 %v164_v53  ;;  %1623 = vmatpush3.msra.mxu0 %v116_v54  ;;  %v222_v24 = vld [vmem:[#allocation2 + $0x360] sm:$0xff]  ;;  %v221_v28 = vld [vmem:[#allocation2 + $0x358] sm:$0xff]  ;;  %v204_v29 = vld [vmem:[#allocation2 + $0x2d0] sm:$0xff] }
  0x49   :  { %1661 = vmatpush3.msra.mxu1 %v148_v55  ;;  %1624 = vmatprep.subr.mxu0 %v131_v58  ;;  %v236_v30 = vld [vmem:[#allocation2 + $0x3d0] sm:$0xff]  ;;  %v203_v33 = vld [vmem:[#allocation2 + $0x2c8] sm:$0xff]  ;;  %v202_v37 = vld [vmem:[#allocation2 + $0x2c0] sm:$0xff] }
  0x4a   :  { %1662 = vmatprep.subr.mxu1 %v163_v59  ;;  %1625 = vmatpush3.msra.mxu0 %v115_v61  ;;  %v188_v31 = vld [vmem:[#allocation2 + $0x250] sm:$0xff]  ;;  %v235_v34 = vld [vmem:[#allocation2 + $0x3c8] sm:$0xff]  ;;  %v234_v38 = vld [vmem:[#allocation2 + $0x3c0] sm:$0xff] }
  0x4b   :  { %1663 = vmatpush3.msra.mxu1 %v147_v62  ;;  %1626 = vmatprep.subr.mxu0 %v130_v0  ;;  %v220_v32 = vld [vmem:[#allocation2 + $0x350] sm:$0xff]  ;;  %v187_v35 = vld [vmem:[#allocation2 + $0x248] sm:$0xff]  ;;  %v186_v39 = vld [vmem:[#allocation2 + $0x240] sm:$0xff] }
  0x4c   :  { %1664 = vmatprep.subr.mxu1 %v162_v1  ;;  %1627 = vmatpush3.msra.mxu0 %v114_v4  ;;  %v219_v36 = vld [vmem:[#allocation2 + $0x348] sm:$0xff]  ;;  %v218_v40 = vld [vmem:[#allocation2 + $0x340] sm:$0xff]  ;;  %v201_v41 = vld [vmem:[#allocation2 + $0x2b8] sm:$0xff] }
  0x4d   :  { %308 = vmatprep.mubr.f32.mxu0 %v99_v2  ;;  %1665 = vmatpush3.msra.mxu1 %v146_v6  ;;  %v233_v42 = vld [vmem:[#allocation2 + $0x3b8] sm:$0xff]  ;;  %v200_v45 = vld [vmem:[#allocation2 + $0x2b0] sm:$0xff]  ;;  %v199_v49 = vld [vmem:[#allocation2 + $0x2a8] sm:$0xff] }
  0x4e   :  { %309 = vmatmul.mubr.f32.vlgmr.msra.gmra.mxu0 %v98_v5  ;;  %383 = vmatprep.mubr.f32.mxu1 %v101_v7  ;;  %v185_v43 = vld [vmem:[#allocation2 + $0x238] sm:$0xff]  ;;  %v232_v46 = vld [vmem:[#allocation2 + $0x3b0] sm:$0xff]  ;;  %v231_v50 = vld [vmem:[#allocation2 + $0x3a8] sm:$0xff] }
  0x4f   :  { %1672 = vmatprep.subr.mxu0 %v209_v8  ;;  %1710 = vmatprep.subr.mxu1 %v241_v10  ;;  %v217_v44 = vld [vmem:[#allocation2 + $0x338] sm:$0xff]  ;;  %v184_v47 = vld [vmem:[#allocation2 + $0x230] sm:$0xff]  ;;  %v183_v51 = vld [vmem:[#allocation2 + $0x228] sm:$0xff] }
  0x50   :  { %384 = vmatmul.mubr.f32.vlgmr.msra.gmra.mxu1 %v100_v9  ;;  %1673 = vmatpush3.msra.mxu0 %v193_v11  ;;  %v216_v48 = vld [vmem:[#allocation2 + $0x330] sm:$0xff]  ;;  %v215_v52 = vld [vmem:[#allocation2 + $0x328] sm:$0xff]  ;;  %v198_v55 = vld [vmem:[#allocation2 + $0x2a0] sm:$0xff] }
  0x51   :  { %1711 = vmatpush3.msra.mxu1 %v225_v12  ;;  %1674 = vmatprep.subr.mxu0 %v208_v13  ;;  %v2348_v53 = vld [vmem:[%s2726_s0 + $0x8] sm:$0xff]  ;;  %v230_v57 = vld [vmem:[#allocation2 + $0x3a0] sm:$0xff]  ;;  %v197_v61 = vld [vmem:[#allocation2 + $0x298] sm:$0xff] }
  0x52   :  { %1712 = vmatprep.subr.mxu1 %v240_v14  ;;  %1675 = vmatpush3.msra.mxu0 %v192_v15  ;;  %v91_v54 = vld [vmem:[%s2727_s1 + $0x48] sm:$0xff]  ;;  %v90_v58 = vld [vmem:[%s2727_s1 + $0x40] sm:$0xff]  ;;  %v229_v62 = vld [vmem:[#allocation2 + $0x398] sm:$0xff] }
  0x53   :  { %1713 = vmatpush3.msra.mxu1 %v224_v16  ;;  %1676 = vmatprep.subr.mxu0 %v207_v17  ;;  %v182_v59 = vld [vmem:[#allocation2 + $0x220] sm:$0xff]  ;;  %v107_v63 = vmul.f32 %v91_v54, %v2348_v53  ;;  %v93_v0 = vld [vmem:[%s2727_s1 + $0x58] sm:$0xff]  ;;  %v106_v2 = vmul.f32 %v90_v58, %v2348_v53  ;;  %v92_v4 = vld [vmem:[%s2727_s1 + $0x50] sm:$0xff] }
  0x54   :  { %1714 = vmatprep.subr.mxu1 %v239_v18  ;;  %1677 = vmatpush3.msra.mxu0 %v191_v19  ;;  %v214_v60 = vld [vmem:[#allocation2 + $0x320] sm:$0xff]  ;;  %v181_v1 = vld [vmem:[#allocation2 + $0x218] sm:$0xff]  ;;  %v196_v5 = vld [vmem:[#allocation2 + $0x290] sm:$0xff]  ;;  %v109_v7 = vmul.f32 %v93_v0, %v2348_v53  ;;  %v108_v10 = vmul.f32 %v92_v4, %v2348_v53 }
  0x55   :  { %1715 = vmatpush3.msra.mxu1 %v223_v20  ;;  %1678 = vmatprep.subr.mxu0 %v206_v21  ;;  %v213_v3 = vld [vmem:[#allocation2 + $0x318] sm:$0xff]  ;;  %v228_v6 = vld [vmem:[#allocation2 + $0x390] sm:$0xff]  ;;  %v195_v11 = vld [vmem:[#allocation2 + $0x288] sm:$0xff] }
  0x56   :  { %1716 = vmatprep.subr.mxu1 %v238_v22  ;;  %1679 = vmatpush3.msra.mxu0 %v190_v23  ;;  %v180_v8 = vld [vmem:[#allocation2 + $0x210] sm:$0xff]  ;;  %v227_v12 = vld [vmem:[#allocation2 + $0x388] sm:$0xff]  ;;  %v89_v16 = vld [vmem:[%s2727_s1 + $0x38] sm:$0xff] }
  0x57   :  { %1717 = vmatpush3.msra.mxu1 %v222_v24  ;;  %1680 = vmatprep.subr.mxu0 %v205_v25  ;;  %v212_v9 = vld [vmem:[#allocation2 + $0x310] sm:$0xff]  ;;  %v87_v13 = vld [vmem:[%s2727_s1 + $0x28] sm:$0xff]  ;;  %v194_v17 = vld [vmem:[#allocation2 + $0x280] sm:$0xff]  ;;  %v105_v25 = vmul.f32 %v89_v16, %v2327_v56 }
  0x58   :  { %1718 = vmatprep.subr.mxu1 %v237_v26  ;;  %1681 = vmatpush3.msra.mxu0 %v189_v27  ;;  %v179_v14 = vld [vmem:[#allocation2 + $0x208] sm:$0xff]  ;;  %v86_v18 = vld [vmem:[%s2727_s1 + $0x20] sm:$0xff]  ;;  %v88_v19 = vld [vmem:[%s2727_s1 + $0x30] sm:$0xff]  ;;  %v103_v21 = vmul.f32 %v87_v13, %v2327_v56 }
  0x59   :  { %1719 = vmatpush3.msra.mxu1 %v221_v28  ;;  %1682 = vmatprep.subr.mxu0 %v204_v29  ;;  %v211_v15 = vld [vmem:[#allocation2 + $0x308] sm:$0xff]  ;;  %v226_v20 = vld [vmem:[#allocation2 + $0x380] sm:$0xff]  ;;  %v97_v23 = vld [vmem:[%s2727_s1 + $0x78] sm:$0xff]  ;;  %v102_v27 = vmul.f32 %v86_v18, %v2327_v56  ;;  %v104_v28 = vmul.f32 %v88_v19, %v2327_v56 }
  0x5a   :  { %1720 = vmatprep.subr.mxu1 %v236_v30  ;;  %1683 = vmatpush3.msra.mxu0 %v188_v31  ;;  %v95_v22 = vld [vmem:[%s2727_s1 + $0x68] sm:$0xff]  ;;  %v178_v24 = vld [vmem:[#allocation2 + $0x200] sm:$0xff]  ;;  %v113_v30 = vmul.f32 %v97_v23, %v2348_v53 }
  0x5b   :  { %1721 = vmatpush3.msra.mxu1 %v220_v32  ;;  %1684 = vmatprep.subr.mxu0 %v203_v33  ;;  %v210_v26 = vld [vmem:[#allocation2 + $0x300] sm:$0xff]  ;;  %v111_v29 = vmul.f32 %v95_v22, %v2348_v53  ;;  %v96_v32 = vld [vmem:[%s2727_s1 + $0x70] sm:$0xff] }
  0x5c   :  { %1722 = vmatprep.subr.mxu1 %v235_v34  ;;  %1685 = vmatpush3.msra.mxu0 %v187_v35  ;;  %v94_v31 = vld [vmem:[%s2727_s1 + $0x60] sm:$0xff]  ;;  %v112_v33 = vmul.f32 %v96_v32, %v2348_v53  ;;  %v2245_v34 = vmov 0.0   ;;  %v2403_v35 = vld [vmem:[%s2734_s8 + $0x78] sm:$0xff] }
  0x5d   :  { %1723 = vmatpush3.msra.mxu1 %v219_v36  ;;  %1686 = vmatprep.subr.mxu0 %v202_v37  ;;  %v110_v56 = vmul.f32 %v94_v31, %v2348_v53  ;;  %v2411_v36 = vld [vmem:[%s2734_s8 + $0x70] sm:$0xff]  ;;  %v2420_v37 = vld [vmem:[%s2734_s8 + $0x68] sm:$0xff] }
  0x5e   :  { %1724 = vmatprep.subr.mxu1 %v234_v38  ;;  %1687 = vmatpush3.msra.mxu0 %v186_v39  ;;  %v2429_v38 = vld [vmem:[%s2734_s8 + $0x60] sm:$0xff]  ;;  %v2438_v39 = vld [vmem:[%s2734_s8 + $0x58] sm:$0xff] }
  0x5f   :  { %1725 = vmatpush3.msra.mxu1 %v218_v40  ;;  %1688 = vmatprep.subr.mxu0 %v201_v41  ;;  %v2447_v40 = vld [vmem:[%s2734_s8 + $0x50] sm:$0xff]  ;;  %v2456_v41 = vld [vmem:[%s2734_s8 + $0x48] sm:$0xff] }
  0x60   :  { %1726 = vmatprep.subr.mxu1 %v233_v42  ;;  %1689 = vmatpush3.msra.mxu0 %v185_v43  ;;  %v2465_v42 = vld [vmem:[%s2734_s8 + $0x40] sm:$0xff]  ;;  %v2474_v43 = vld [vmem:[%s2734_s8 + $0x38] sm:$0xff] }
  0x61   :  { %1727 = vmatpush3.msra.mxu1 %v217_v44  ;;  %1690 = vmatprep.subr.mxu0 %v200_v45  ;;  %v2483_v44 = vld [vmem:[%s2734_s8 + $0x30] sm:$0xff]  ;;  %v2492_v45 = vld [vmem:[%s2734_s8 + $0x28] sm:$0xff] }
  0x62   :  { %1728 = vmatprep.subr.mxu1 %v232_v46  ;;  %1691 = vmatpush3.msra.mxu0 %v184_v47  ;;  %v2501_v46 = vld [vmem:[%s2734_s8 + $0x20] sm:$0xff]  ;;  %v2510_v47 = vld [vmem:[%s2734_s8 + $0x18] sm:$0xff] }
  0x63   :  { %1729 = vmatpush3.msra.mxu1 %v216_v48  ;;  %1692 = vmatprep.subr.mxu0 %v199_v49  ;;  %v2519_v48 = vld [vmem:[%s2734_s8 + $0x10] sm:$0xff]  ;;  %v2528_v49 = vld [vmem:[%s2734_s8 + $0x8] sm:$0xff] }
  0x64   :  { %1730 = vmatprep.subr.mxu1 %v231_v50  ;;  %1693 = vmatpush3.msra.mxu0 %v183_v51  ;;  %v2534_v50 = vld [vmem:[%s2734_s8] sm:$0xff] }
  0x65   :  { %1731 = vmatpush3.msra.mxu1 %v215_v52  ;;  %1694 = vmatprep.subr.mxu0 %v198_v55 }
  0x66   :  { %1732 = vmatprep.subr.mxu1 %v230_v57  ;;  %1695 = vmatpush3.msra.mxu0 %v182_v59  ;;  %v242_v59 = vld [vmem:[%s2729_s3] sm:$0xff] }
  0x67   :  { %1733 = vmatpush3.msra.mxu1 %v214_v60  ;;  %1696 = vmatprep.subr.mxu0 %v197_v61 }
  0x68   :  { %1734 = vmatprep.subr.mxu1 %v229_v62  ;;  %313 = vmatprep.mubr.f32.mxu0 %v107_v63 }
  0x69   :  { %1697 = vmatpush3.msra.mxu0 %v181_v1  ;;  %1735 = vmatpush3.msra.mxu1 %v213_v3  ;;  %v243_v1 = vld [vmem:[%s2729_s3 + $0x8] sm:$0xff] }
  0x6a   :  { %314 = vmatmul.mubr.f32.gmra.mxu0 %v106_v2  ;;  %1698 = vmatprep.subr.mxu0 %v196_v5 }
  0x6b   :  { %1736 = vmatprep.subr.mxu1 %v228_v6  ;;  %388 = vmatprep.mubr.f32.mxu1 %v109_v7 }
  0x6c   :  { %1699 = vmatpush3.msra.mxu0 %v180_v8  ;;  %1737 = vmatpush3.msra.mxu1 %v212_v9 }
  0x6d   :  { %1700 = vmatprep.subr.mxu0 %v195_v11  ;;  %389 = vmatmul.mubr.f32.gmra.mxu1 %v108_v10 }
  0x6e   :  { %1738 = vmatprep.subr.mxu1 %v227_v12  ;;  %1701 = vmatpush3.msra.mxu0 %v179_v14 }
  0x6f   :  { %1739 = vmatpush3.msra.mxu1 %v211_v15  ;;  %1702 = vmatprep.subr.mxu0 %v194_v17 }
  0x70   :  { %1740 = vmatprep.subr.mxu1 %v226_v20  ;;  %1703 = vmatpush3.msra.mxu0 %v178_v24 }
  0x71   :  { %458 = vmatprep.mubr.f32.mxu0 %v103_v21  ;;  %1741 = vmatpush3.msra.mxu1 %v210_v26 }
  0x72   :  { %533 = vmatprep.mubr.f32.mxu1 %v105_v25  ;;  %459 = vmatmul.mubr.f32.vlgmr.msra.gmra.mxu0 %v102_v27 }
  0x73   :  { %534 = vmatmul.mubr.f32.vlgmr.msra.gmra.mxu1 %v104_v28  ;;  %463 = vmatprep.mubr.f32.mxu0 %v111_v29 }
  0x74   :  { %538 = vmatprep.mubr.f32.mxu1 %v113_v30  ;;  %1878 = vmatprep.subr.mxu0 %v2245_v34 }
  0x75   :  { %1913 = vmatprep.subr.mxu1 %v2245_v34  ;;  %1879 = vmatpush3.msra.mxu0 %v2403_v35 }
  0x76   :  { %464 = vmatmul.mubr.f32.gmra.mxu0 %v110_v56  ;;  %1914 = vmatpush3.msra.mxu1 %v2403_v35 }
  0x77   :  { %539 = vmatmul.mubr.f32.gmra.mxu1 %v112_v33  ;;  %1880 = vmatprep.subr.mxu0 %v2245_v34 }
  0x78   :  { %1915 = vmatprep.subr.mxu1 %v2245_v34  ;;  %1881 = vmatpush3.msra.mxu0 %v2411_v36 }
  0x79   :  { %1916 = vmatpush3.msra.mxu1 %v2411_v36  ;;  %1882 = vmatprep.subr.mxu0 %v2245_v34 }
  0x7a   :  { %1917 = vmatprep.subr.mxu1 %v2245_v34  ;;  %1883 = vmatpush3.msra.mxu0 %v2420_v37 }
  0x7b   :  { %1918 = vmatpush3.msra.mxu1 %v2420_v37  ;;  %1884 = vmatprep.subr.mxu0 %v2245_v34 }
  0x7c   :  { %1919 = vmatprep.subr.mxu1 %v2245_v34  ;;  %1885 = vmatpush3.msra.mxu0 %v2429_v38 }
  0x7d   :  { %1920 = vmatpush3.msra.mxu1 %v2429_v38  ;;  %1886 = vmatprep.subr.mxu0 %v2245_v34 }
  0x7e   :  { %1921 = vmatprep.subr.mxu1 %v2245_v34  ;;  %1887 = vmatpush3.msra.mxu0 %v2438_v39 }
  0x7f   :  { %1922 = vmatpush3.msra.mxu1 %v2438_v39  ;;  %1888 = vmatprep.subr.mxu0 %v2245_v34 }
  0x80   :  { %1923 = vmatprep.subr.mxu1 %v2245_v34  ;;  %1889 = vmatpush3.msra.mxu0 %v2447_v40 }
  0x81   :  { %1924 = vmatpush3.msra.mxu1 %v2447_v40  ;;  %1890 = vmatprep.subr.mxu0 %v2245_v34 }
  0x82   :  { %1925 = vmatprep.subr.mxu1 %v2245_v34  ;;  %1891 = vmatpush3.msra.mxu0 %v2456_v41 }
  0x83   :  { %1926 = vmatpush3.msra.mxu1 %v2456_v41  ;;  %1892 = vmatprep.subr.mxu0 %v2245_v34 }
  0x84   :  { %1927 = vmatprep.subr.mxu1 %v2245_v34  ;;  %1893 = vmatpush3.msra.mxu0 %v2465_v42 }
  0x85   :  { %1928 = vmatpush3.msra.mxu1 %v2465_v42  ;;  %1894 = vmatprep.subr.mxu0 %v2245_v34 }
  0x86   :  { %1929 = vmatprep.subr.mxu1 %v2245_v34  ;;  %1895 = vmatpush3.msra.mxu0 %v2474_v43 }
  0x87   :  { %1930 = vmatpush3.msra.mxu1 %v2474_v43  ;;  %1896 = vmatprep.subr.mxu0 %v2245_v34 }
  0x88   :  { %1931 = vmatprep.subr.mxu1 %v2245_v34  ;;  %1897 = vmatpush3.msra.mxu0 %v2483_v44 }
  0x89   :  { %1932 = vmatpush3.msra.mxu1 %v2483_v44  ;;  %1898 = vmatprep.subr.mxu0 %v2245_v34 }
  0x8a   :  { %1933 = vmatprep.subr.mxu1 %v2245_v34  ;;  %1899 = vmatpush3.msra.mxu0 %v2492_v45 }
  0x8b   :  { %1934 = vmatpush3.msra.mxu1 %v2492_v45  ;;  %1900 = vmatprep.subr.mxu0 %v2245_v34 }
  0x8c   :  { %1935 = vmatprep.subr.mxu1 %v2245_v34  ;;  %1901 = vmatpush3.msra.mxu0 %v2501_v46 }
  0x8d   :  { %1936 = vmatpush3.msra.mxu1 %v2501_v46  ;;  %1902 = vmatprep.subr.mxu0 %v2245_v34 }
  0x8e   :  { %1937 = vmatprep.subr.mxu1 %v2245_v34  ;;  %1903 = vmatpush3.msra.mxu0 %v2510_v47 }
  0x8f   :  { %1938 = vmatpush3.msra.mxu1 %v2510_v47  ;;  %1904 = vmatprep.subr.mxu0 %v2245_v34 }
  0x90   :  { %1939 = vmatprep.subr.mxu1 %v2245_v34  ;;  %1905 = vmatpush3.msra.mxu0 %v2519_v48 }
  0x91   :  { %1940 = vmatpush3.msra.mxu1 %v2519_v48  ;;  %1906 = vmatprep.subr.mxu0 %v2245_v34 }
  0x92   :  { %1941 = vmatprep.subr.mxu1 %v2245_v34  ;;  %1907 = vmatpush3.msra.mxu0 %v2528_v49 }
  0x93   :  { %1910 = vmatprep.mubr.msk.f32.mxu0 %vm2246_vm0, %v2245_v34  ;;  %1908 = vmatprep.subr.mxu0 %v2245_v34 }
  0x94   :  { %1942 = vmatpush3.msra.mxu1 %v2528_v49  ;;  %1909 = vmatpush3.msra.mxu0 %v2534_v50 }
  0x95   :  { %1943 = vmatprep.subr.mxu1 %v2245_v34  ;;  %1945 = vmatprep.mubr.msk.f32.mxu1 %vm2246_vm0, %v2245_v34 }
  0x96   :  { %1944 = vmatpush3.msra.mxu1 %v2534_v50 }
  0x97   :  { %1948 = vmatprep.subr.mxu1 %v2245_v34 }
 0x10e   :  { %v1628_v51 = vpop.f32.mrf.mxu0 }
 0x110   :  { %v1666_v52 = vpop.f32.mrf.mxu1  ;;  %v1629_v53 = vpop.f32.mrf.mxu0 }
 0x111   :  { %v1630_v57 = vadd.f32 %v1629_v53, %v1628_v51 }
 0x112   :  { %v1667_v55 = vpop.f32.mrf.mxu1 }
 0x113   :  { %v311_v62 = vadd.f32 %v1630_v57, %v242_v59  ;;  %v1668_v63 = vadd.f32 %v1667_v55, %v1666_v52  ;;  %v922_v55 = vld [vmem:[%s2732_s6] sm:$0xff]  ;;  %v923_v59 = vld [vmem:[%s2732_s6 + $0x8] sm:$0xff] }
 0x114   :  { %v1590_v57 = vld [vmem:[%s2732_s6 + $0x20] sm:$0xff] }
 0x115   :  { %v386_v6 = vadd.f32 %v1668_v63, %v311_v62  ;;  %v950_v62 = vld [vmem:[#allocation6 + $0x70] sm:$0xff]  ;;  %v949_v63 = vld [vmem:[#allocation6 + $0x68] sm:$0xff] }
 0x12a   :  { %v1631_v54 = vpop.f32.mrf.mxu0 }
 0x12c   :  { %v1632_v60 = vpop.f32.mrf.mxu0 }
 0x12d   :  { %v1669_v58 = vpop.f32.mrf.mxu1  ;;  %v1633_v0 = vadd.f32 %v1632_v60, %v1631_v54  ;;  %v2568_v54 = vld [vmem:[%s2735_s9] sm:$0xff]  ;;  %v1591_v60 = vld [vmem:[%s2732_s6 + $0x28] sm:$0xff] }
 0x12f   :  { %v1670_v61 = vpop.f32.mrf.mxu1  ;;  %v316_v7 = vadd.f32 %v1633_v0, %v243_v1  ;;  %v948_v0 = vld [vmem:[#allocation6 + $0x60] sm:$0xff]  ;;  %v947_v1 = vld [vmem:[#allocation6 + $0x58] sm:$0xff] }
 0x130   :  { %v1671_v8 = vadd.f32 %v1670_v61, %v1669_v58  ;;  %v2247_v58 = vmov 0   ;;  %v951_v61 = vld [vmem:[#allocation6 + $0x78] sm:$0xff] }
 0x131   :  { %2152 = vset.pattern.permute.xlu0 %v2247_v58  ;;  %2153 = vset.pattern.permute.xlu1 %v2247_v58  ;;  %v901_v58 = vld [vmem:[#allocation6 + $0x90] sm:$0xff] }
 0x132   :  { %v1704_v2 = vpop.f32.mrf.mxu0  ;;  %v391_v15 = vadd.f32 %v1671_v8, %v316_v7  ;;  %926 = vperm.xlu0 %2152, %v922_v55   ;;  %1112 = vperm.xlu1 %2153, %v1590_v57   ;;  %v902_v55 = vld [vmem:[#allocation6 + $0x98] sm:$0xff]  ;;  %v940_v57 = vld [vmem:[#allocation6 + $0x20] sm:$0xff] }
 0x133   :  { %v1742_v3 = vpop.f32.mrf.mxu1  ;;  %1958 = vmatprep.subr.mxu0 %v951_v61 }
 0x134   :  { %v1705_v4 = vpop.f32.mrf.mxu0 }
 0x135   :  { %v1743_v5 = vpop.f32.mrf.mxu1  ;;  %v1706_v9 = vadd.f32 %v1705_v4, %v1704_v2  ;;  %v946_v2 = vld [vmem:[#allocation6 + $0x50] sm:$0xff] }
 0x136   :  { %v1707_v10 = vpop.f32.mrf.mxu0  ;;  %v1744_v16 = vadd.f32 %v1743_v5, %v1742_v3  ;;  %931 = vperm.xlu0 %2152, %v923_v59   ;;  %1117 = vperm.xlu1 %2153, %v1591_v60   ;;  %v939_v59 = vld [vmem:[#allocation6 + $0x18] sm:$0xff]  ;;  %v900_v60 = vld [vmem:[#allocation6 + $0x88] sm:$0xff] }
 0x137   :  { %v1745_v11 = vpop.f32.mrf.mxu1  ;;  %v461_v12 = vadd.f32 %v1706_v9, %v386_v6 }
 0x138   :  { %v1708_v13 = vpop.f32.mrf.mxu0 }
 0x139   :  { %v1746_v14 = vpop.f32.mrf.mxu1  ;;  %v1709_v17 = vadd.f32 %v1708_v13, %v1707_v10  ;;  %v2553_v18 = vadd.f32 %v1744_v16, %v461_v12  ;;  %v2587_v12 = vld [vmem:[%s2733_s7] sm:$0xf]  ;;  %s890_s7 = sld [smem:[#allocation8]] }
 0x13a   :  { %v1747_v20 = vadd.f32 %v1746_v14, %v1745_v11 }
 0x13b   :  { %v466_v19 = vadd.f32 %v1709_v17, %v391_v15  ;;  %v569_v22 = vmul.f32 %v2553_v18, %v2553_v18  ;;  %v914_v15 = vld [vmem:[#allocation6 + $0xf8] sm:$0xff] }
 0x13d   :  { %v2555_v21 = vadd.f32 %v1747_v20, %v466_v19 }
 0x13f   :  { %v562_v23 = vadd.f32 %v2555_v21, %v2553_v18  ;;  %v570_v24 = vmul.f32 %v2555_v21, %v2555_v21 }
 0x141   :  { %v563_v25 = vrot.slane %v562_v23, 4  ;;  %v571_v26 = vadd.f32 %v570_v24, %v569_v22  ;;  %v913_v22 = vld [vmem:[#allocation6 + $0xf0] sm:$0xff]  ;;  %v911_v24 = vld [vmem:[#allocation6 + $0xe0] sm:$0xff] }
 0x143   :  { %v564_v27 = vadd.f32 %v563_v25, %v562_v23  ;;  %v572_v28 = vrot.slane %v571_v26, 4  ;;  %v912_v23 = vld [vmem:[#allocation6 + $0xe8] sm:$0xff]  ;;  %v910_v25 = vld [vmem:[#allocation6 + $0xd8] sm:$0xff] }
 0x145   :  { %v565_v29 = vrot.slane %v564_v27, 2  ;;  %v573_v30 = vadd.f32 %v572_v28, %v571_v26  ;;  %v909_v26 = vld [vmem:[#allocation6 + $0xd0] sm:$0xff]  ;;  %v907_v28 = vld [vmem:[#allocation6 + $0xc0] sm:$0xff] }
 0x147   :  { %v566_v31 = vadd.f32 %v565_v29, %v564_v27  ;;  %v574_v32 = vrot.slane %v573_v30, 2  ;;  %v908_v27 = vld [vmem:[#allocation6 + $0xc8] sm:$0xff] }
 0x148   :  { %v945_v29 = vld [vmem:[#allocation6 + $0x48] sm:$0xff] }
 0x149   :  { %v567_v56 = vrot.slane %v566_v31, 1  ;;  %v575_v33 = vadd.f32 %v574_v32, %v573_v30  ;;  %v906_v30 = vld [vmem:[#allocation6 + $0xb8] sm:$0xff]  ;;  %v905_v32 = vld [vmem:[#allocation6 + $0xb0] sm:$0xff] }
 0x14b   :  { %v568_v51 = vadd.f32 %v567_v56, %v566_v31  ;;  %v576_v52 = vrot.slane %v575_v33, 1  ;;  %v944_v31 = vld [vmem:[#allocation6 + $0x40] sm:$0xff]  ;;  %v943_v56 = vld [vmem:[#allocation6 + $0x38] sm:$0xff] }
 0x14d   :  { %1911 = vmatmul.mubr.f32.vlgmr.msra.gmra.mxu0 %v568_v51  ;;  %v577_v53 = vadd.f32 %v576_v52, %v575_v33  ;;  %v904_v33 = vld [vmem:[#allocation6 + $0xa8] sm:$0xff]  ;;  %v942_v51 = vld [vmem:[#allocation6 + $0x30] sm:$0xff]  ;;  %v903_v52 = vld [vmem:[#allocation6 + $0xa0] sm:$0xff] }
 0x14e   :  { %1959 = vmatpush3.msra.mxu0 %v951_v61  ;;  %v938_v61 = vld [vmem:[#allocation6 + $0x10] sm:$0xff] }
 0x14f   :  { %1946 = vmatmul.mubr.f32.vlgmr.msra.gmra.mxu1 %v577_v53  ;;  %1960 = vmatprep.subr.mxu0 %v950_v62  ;;  %v941_v53 = vld [vmem:[#allocation6 + $0x28] sm:$0xff] }
 0x150   :  { %1950 = vmatprep.mubr.msk.f32.mxu1 %vm2246_vm0, %v2245_v34  ;;  %1949 = vmatpush3.msra.mxu1 %v2568_v54 }
 0x151   :  { %1953 = vmatprep.subr.mxu1 %v2245_v34  ;;  %1961 = vmatpush3.msra.mxu0 %v950_v62  ;;  %v899_v62 = vld [vmem:[#allocation6 + $0x80] sm:$0xff] }
 0x152   :  { %1962 = vmatprep.subr.mxu0 %v949_v63 }
 0x153   :  { %1963 = vmatpush3.msra.mxu0 %v949_v63  ;;  %v937_v63 = vld [vmem:[#allocation6 + $0x8] sm:$0xff] }
 0x154   :  { %1964 = vmatprep.subr.mxu0 %v948_v0 }
 0x155   :  { %1965 = vmatpush3.msra.mxu0 %v948_v0  ;;  %v936_v0 = vld [vmem:[#allocation6] sm:$0xff] }
 0x156   :  { %1966 = vmatprep.subr.mxu0 %v947_v1 }
 0x157   :  { %1967 = vmatpush3.msra.mxu0 %v947_v1  ;;  %v1138_v1 = vld [vmem:[#allocation6 + $0x178] sm:$0xff] }
 0x158   :  { %1968 = vmatprep.subr.mxu0 %v946_v2 }
 0x159   :  { %1969 = vmatpush3.msra.mxu0 %v946_v2  ;;  %v878_v2 = vlaneseq }
 0x15a   :  { %1970 = vmatprep.subr.mxu0 %v945_v29 }
 0x15b   :  { %1971 = vmatpush3.msra.mxu0 %v945_v29 }
 0x15c   :  { %1972 = vmatprep.subr.mxu0 %v944_v31 }
 0x15d   :  { %1973 = vmatpush3.msra.mxu0 %v944_v31 }
 0x15e   :  { %1974 = vmatprep.subr.mxu0 %v943_v56 }
 0x15f   :  { %1975 = vmatpush3.msra.mxu0 %v943_v56 }
 0x160   :  { %1976 = vmatprep.subr.mxu0 %v942_v51 }
 0x161   :  { %1977 = vmatpush3.msra.mxu0 %v942_v51  ;;  %v1136_v51 = vld [vmem:[#allocation6 + $0x168] sm:$0xff] }
 0x162   :  { %1978 = vmatprep.subr.mxu0 %v941_v53 }
 0x163   :  { %1979 = vmatpush3.msra.mxu0 %v941_v53  ;;  %v1134_v53 = vld [vmem:[#allocation6 + $0x158] sm:$0xff] }
 0x164   :  { %1980 = vmatprep.subr.mxu0 %v940_v57 }
 0x165   :  { %1981 = vmatpush3.msra.mxu0 %v940_v57  ;;  %v1132_v57 = vld [vmem:[#allocation6 + $0x148] sm:$0xff] }
 0x166   :  { %1982 = vmatprep.subr.mxu0 %v939_v59 }
 0x167   :  { %1983 = vmatpush3.msra.mxu0 %v939_v59  ;;  %v1130_v59 = vld [vmem:[#allocation6 + $0x138] sm:$0xff] }
 0x168   :  { %1984 = vmatprep.subr.mxu0 %v938_v61 }
 0x169   :  { %1985 = vmatpush3.msra.mxu0 %v938_v61  ;;  %v1128_v61 = vld [vmem:[#allocation6 + $0x128] sm:$0xff] }
 0x16a   :  { %1986 = vmatprep.subr.mxu0 %v937_v63 }
 0x16b   :  { %1987 = vmatpush3.msra.mxu0 %v937_v63  ;;  %v1126_v63 = vld [vmem:[#allocation6 + $0x118] sm:$0xff] }
 0x16c   :  { %1988 = vmatprep.subr.mxu0 %v936_v0 }
 0x16d   :  { %1989 = vmatpush3.msra.mxu0 %v936_v0  ;;  %v1125_v0 = vld [vmem:[#allocation6 + $0x110] sm:$0xff] }
 0x16e   :  { %2028 = vmatprep.subr.mxu0 %v1138_v1 }
 0x20d   :  { %v644_v3 = vpop.f32.mrf.mxu0 }
 0x20e   :  { %v648_v4 = vmul.f32 0.00390625, %v644_v3  ;;  %v2597_v3 = vshrl.u32 %v878_v2, 7 }
 0x20f   :  { %v1912_v5 = vpop.f32.mrf.mxu0  ;;  %v715_v6 = vpop.f32.mrf.mxu1 }
 0x210   :  { %v720_v7 = vmul.f32 %v648_v4, %v648_v4  ;;  %v719_v8 = vmul.f32 0.00390625, %v715_v6  ;;  %v2600_v5 = vsub.s32 0, %v2597_v3  ;;  %vm919_vm4 = vcmp.lt.s32.totalorder %v2597_v3, 2 }
 0x211   :  { %v1947_v9 = vpop.f32.mrf.mxu1  ;;  %vm1104_vm5 = vcmp.lt.s32.totalorder %v2597_v3, 6 }
 0x212   :  { %v721_v10 = vsub.f32 %v719_v8, %v720_v7 }
 0x214   :  { %v722_v11 = vadd.f32 1e-05, %v721_v10 }
 0x216   :  { %2154 = vrsqrt.f32 %v722_v11 }
 0x223   :  { %v2155_v13 = vpop.eup %2154 }
 0x224   :  { %v724_v14 = vmul.f32 %v2155_v13, %v2587_v12  ;;  %v893_v13 = vstv %s890_s7 }
 0x226   :  { %v725_v16 = vmul.f32 %v724_v14, %v648_v4  ;;  %1951 = vmatmul.mubr.msk.f32.vlgmr.msra.gmra.mxu1 %vm730_vm1, %v724_v14 }
 0x227   :  { %1954 = vmatpush3.msra.mxu1 %v2568_v54  ;;  %1955 = vmatprep.mubr.msk.f32.mxu1 %vm2246_vm0, %v2245_v34 }
 0x228   :  { %v727_v17 = vrot.slane %v725_v16, 7  ;;  %1993 = vmatprep.subr.mxu1 %v914_v15 }
 0x22a   :  { %v729_v19 = vsub.f32 %v2587_v12, %v727_v17  ;;  %v927_v17 = vpop.permute.xlu0 %926 }
 0x22c   :  { %v805_v20 = vrot.slane %v729_v19, 1 }
 0x22e   :  { %1956 = vmatmul.mubr.msk.f32.vlgmr.msra.gmra.mxu1 %vm730_vm1, %v805_v20 }
 0x22f   :  { %1994 = vmatpush3.msra.mxu1 %v914_v15 }
 0x230   :  { %1995 = vmatprep.subr.mxu1 %v913_v22 }
 0x231   :  { %1996 = vmatpush3.msra.mxu1 %v913_v22 }
 0x232   :  { %1997 = vmatprep.subr.mxu1 %v912_v23 }
 0x233   :  { %1998 = vmatpush3.msra.mxu1 %v912_v23 }
 0x234   :  { %1999 = vmatprep.subr.mxu1 %v911_v24 }
 0x235   :  { %2000 = vmatpush3.msra.mxu1 %v911_v24 }
 0x236   :  { %2001 = vmatprep.subr.mxu1 %v910_v25 }
 0x237   :  { %2002 = vmatpush3.msra.mxu1 %v910_v25 }
 0x238   :  { %2003 = vmatprep.subr.mxu1 %v909_v26 }
 0x239   :  { %2004 = vmatpush3.msra.mxu1 %v909_v26 }
 0x23a   :  { %2005 = vmatprep.subr.mxu1 %v908_v27 }
 0x23b   :  { %2006 = vmatpush3.msra.mxu1 %v908_v27 }
 0x23c   :  { %2007 = vmatprep.subr.mxu1 %v907_v28 }
 0x23d   :  { %2008 = vmatpush3.msra.mxu1 %v907_v28  ;;  %v932_v28 = vpop.permute.xlu0 %931 }
 0x23e   :  { %2009 = vmatprep.subr.mxu1 %v906_v30 }
 0x23f   :  { %2010 = vmatpush3.msra.mxu1 %v906_v30 }
 0x240   :  { %2011 = vmatprep.subr.mxu1 %v905_v32 }
 0x241   :  { %2012 = vmatpush3.msra.mxu1 %v905_v32  ;;  %v1113_v32 = vpop.permute.xlu1 %1112 }
 0x242   :  { %2013 = vmatprep.subr.mxu1 %v904_v33 }
 0x243   :  { %2014 = vmatpush3.msra.mxu1 %v904_v33  ;;  %v1137_v33 = vld [vmem:[#allocation6 + $0x170] sm:$0xff] }
 0x244   :  { %2015 = vmatprep.subr.mxu1 %v903_v52 }
 0x245   :  { %2016 = vmatpush3.msra.mxu1 %v903_v52  ;;  %v1135_v52 = vld [vmem:[#allocation6 + $0x160] sm:$0xff]  ;;  %v1118_v2 = vpop.permute.xlu1 %1117 }
 0x246   :  { %2017 = vmatprep.subr.mxu1 %v902_v55 }
 0x247   :  { %2018 = vmatpush3.msra.mxu1 %v902_v55  ;;  %v1133_v55 = vld [vmem:[#allocation6 + $0x150] sm:$0xff] }
 0x248   :  { %2019 = vmatprep.subr.mxu1 %v901_v58 }
 0x249   :  { %2020 = vmatpush3.msra.mxu1 %v901_v58  ;;  %v1131_v58 = vld [vmem:[#allocation6 + $0x140] sm:$0xff] }
 0x24a   :  { %2021 = vmatprep.subr.mxu1 %v900_v60 }
 0x24b   :  { %2022 = vmatpush3.msra.mxu1 %v900_v60  ;;  %v1129_v60 = vld [vmem:[#allocation6 + $0x130] sm:$0xff] }
 0x24c   :  { %2023 = vmatprep.subr.mxu1 %v899_v62 }
 0x24d   :  { %2024 = vmatpush3.msra.mxu1 %v899_v62  ;;  %v1127_v62 = vld [vmem:[#allocation6 + $0x120] sm:$0xff] }
 0x24e   :  { %2063 = vmatprep.subr.mxu1 %v2245_v34 }
 0x2e6   :  { %v800_v4 = vpop.f32.mrf.mxu1 }
 0x2e7   :  { %v881_v7 = vrot.slane %v800_v4, %v2600_v5 }
 0x2e8   :  { %v1952_v6 = vpop.f32.mrf.mxu1 }
 0x2e9   :  { %v882_v9 = vmul.f32 %v881_v7, %v2553_v18  ;;  %v883_v10 = vmul.f32 %v881_v7, %v2555_v21  ;;  %v1123_v6 = vld [vmem:[#allocation6 + $0x100] sm:$0xff] }
 0x2ee   :  { %v874_v8 = vpop.f32.mrf.mxu1 }
 0x2ef   :  { %v887_v11 = vrot.slane %v874_v8, %v2600_v5 }
 0x2f0   :  { %v1957_v14 = vpop.f32.mrf.mxu1 }
 0x2f1   :  { %v888_v15 = vadd.f32 %v887_v11, %v882_v9  ;;  %v889_v16 = vadd.f32 %v887_v11, %v883_v10 }
 0x2f3   :  { %vm891_vm2 = vcmp.ge.f32.partialorder %v888_v15, 0.0  ;;  %vm892_vm3 = vcmp.ge.f32.partialorder %v889_v16, 0.0  ;;  %v894_v19 = vmul.f32 %v893_v13, %v888_v15  ;;  %v895_v20 = vmul.f32 %v893_v13, %v889_v16 }
 0x2f5   :  { %v2606_v22 = vsel %vm891_vm2, %v888_v15, %v894_v19  ;;  %v2608_v23 = vsel %vm892_vm3, %v889_v16, %v895_v20 }
 0x2f6   :  { %v915_v18 = vrot.slane %v2606_v22, 6  ;;  %v916_v21 = vrot.slane %v2608_v23, 6  ;;  %v1102_v24 = vrot.slane %v2606_v22, 2  ;;  %v1103_v25 = vrot.slane %v2608_v23, 2  ;;  %2025 = vmatprep.mubr.f32.mxu1 %v2606_v22 }
 0x2f7   :  { %2026 = vmatmul.mubr.f32.vlgmr.msra.gmra.mxu1 %v2608_v23 }
 0x2f8   :  { %v921_v26 = vsel %vm919_vm4, %v916_v21, %v915_v18  ;;  %v1105_v27 = vsel %vm1104_vm5, %v1102_v24, %v1103_v25  ;;  %v920_v29 = vsel %vm919_vm4, %v915_v18, %v916_v21  ;;  %2064 = vmatpush3.msra.mxu1 %v2403_v35  ;;  %2095 = vmatprep.mubr.msk.f32.mxu1 %vm2246_vm0, %v2245_v34 }
 0x2f9   :  { %v934_v30 = vmul.f32 %v927_v17, %v921_v26  ;;  %v935_v31 = vmul.f32 %v932_v28, %v920_v29  ;;  %2065 = vmatprep.subr.mxu1 %v2245_v34  ;;  %v1120_v56 = vmul.f32 %v1113_v32, %v1105_v27  ;;  %v1106_v4 = vsel %vm1104_vm5, %v1103_v25, %v1102_v24 }
 0x2fa   :  { %2066 = vmatpush3.msra.mxu1 %v2411_v36  ;;  %v1121_v7 = vmul.f32 %v1118_v2, %v1106_v4  ;;  %v2159_v2 = vld [vmem:[%s2726_s0 + $0x8] sm:$0xff] }
 0x2fb   :  { %1990 = vmatprep.mubr.f32.mxu0 %v934_v30  ;;  %2067 = vmatprep.subr.mxu1 %v2245_v34 }
 0x2fc   :  { %1991 = vmatmul.mubr.f32.vlgmr.msra.gmra.mxu0 %v935_v31  ;;  %2068 = vmatpush3.msra.mxu1 %v2420_v37 }
 0x2fd   :  { %2029 = vmatpush3.msra.mxu0 %v1138_v1  ;;  %2060 = vmatprep.mubr.f32.mxu0 %v1120_v56  ;;  %v1124_v1 = vld [vmem:[#allocation6 + $0x108] sm:$0xff] }
 0x2fe   :  { %2030 = vmatprep.subr.mxu0 %v1137_v33  ;;  %2069 = vmatprep.subr.mxu1 %v2245_v34 }
 0x2ff   :  { %2031 = vmatpush3.msra.mxu0 %v1137_v33  ;;  %2070 = vmatpush3.msra.mxu1 %v2429_v38 }
 0x300   :  { %2032 = vmatprep.subr.mxu0 %v1136_v51  ;;  %2071 = vmatprep.subr.mxu1 %v2245_v34 }
 0x301   :  { %2033 = vmatpush3.msra.mxu0 %v1136_v51  ;;  %2072 = vmatpush3.msra.mxu1 %v2438_v39 }
 0x302   :  { %2034 = vmatprep.subr.mxu0 %v1135_v52  ;;  %2073 = vmatprep.subr.mxu1 %v2245_v34 }
 0x303   :  { %2035 = vmatpush3.msra.mxu0 %v1135_v52  ;;  %2074 = vmatpush3.msra.mxu1 %v2447_v40 }
 0x304   :  { %2036 = vmatprep.subr.mxu0 %v1134_v53  ;;  %2075 = vmatprep.subr.mxu1 %v2245_v34 }
 0x305   :  { %2037 = vmatpush3.msra.mxu0 %v1134_v53  ;;  %2076 = vmatpush3.msra.mxu1 %v2456_v41 }
 0x306   :  { %2038 = vmatprep.subr.mxu0 %v1133_v55  ;;  %2077 = vmatprep.subr.mxu1 %v2245_v34 }
 0x307   :  { %2039 = vmatpush3.msra.mxu0 %v1133_v55  ;;  %2078 = vmatpush3.msra.mxu1 %v2465_v42 }
 0x308   :  { %2040 = vmatprep.subr.mxu0 %v1132_v57  ;;  %2079 = vmatprep.subr.mxu1 %v2245_v34 }
 0x309   :  { %2041 = vmatpush3.msra.mxu0 %v1132_v57  ;;  %2080 = vmatpush3.msra.mxu1 %v2474_v43 }
 0x30a   :  { %2042 = vmatprep.subr.mxu0 %v1131_v58  ;;  %2081 = vmatprep.subr.mxu1 %v2245_v34 }
 0x30b   :  { %2043 = vmatpush3.msra.mxu0 %v1131_v58  ;;  %2082 = vmatpush3.msra.mxu1 %v2483_v44 }
 0x30c   :  { %2044 = vmatprep.subr.mxu0 %v1130_v59  ;;  %2083 = vmatprep.subr.mxu1 %v2245_v34 }
 0x30d   :  { %2045 = vmatpush3.msra.mxu0 %v1130_v59  ;;  %2084 = vmatpush3.msra.mxu1 %v2492_v45 }
 0x30e   :  { %2046 = vmatprep.subr.mxu0 %v1129_v60  ;;  %2085 = vmatprep.subr.mxu1 %v2245_v34 }
 0x30f   :  { %2047 = vmatpush3.msra.mxu0 %v1129_v60  ;;  %2086 = vmatpush3.msra.mxu1 %v2501_v46 }
 0x310   :  { %2048 = vmatprep.subr.mxu0 %v1128_v61  ;;  %2087 = vmatprep.subr.mxu1 %v2245_v34 }
 0x311   :  { %2049 = vmatpush3.msra.mxu0 %v1128_v61  ;;  %2088 = vmatpush3.msra.mxu1 %v2510_v47 }
 0x312   :  { %2050 = vmatprep.subr.mxu0 %v1127_v62  ;;  %2089 = vmatprep.subr.mxu1 %v2245_v34 }
 0x313   :  { %2051 = vmatpush3.msra.mxu0 %v1127_v62  ;;  %2090 = vmatpush3.msra.mxu1 %v2519_v48 }
 0x314   :  { %2052 = vmatprep.subr.mxu0 %v1126_v63  ;;  %2091 = vmatprep.subr.mxu1 %v2245_v34 }
 0x315   :  { %2053 = vmatpush3.msra.mxu0 %v1126_v63  ;;  %2092 = vmatpush3.msra.mxu1 %v2528_v49 }
 0x316   :  { %2054 = vmatprep.subr.mxu0 %v1125_v0  ;;  %2093 = vmatprep.subr.mxu1 %v2245_v34 }
 0x317   :  { %2055 = vmatpush3.msra.mxu0 %v1125_v0  ;;  %2094 = vmatpush3.msra.mxu1 %v2534_v50 }
 0x318   :  { %2056 = vmatprep.subr.mxu0 %v1124_v1  ;;  %2133 = vmatprep.subr.mxu1 %v2245_v34 }
 0x319   :  { %2057 = vmatpush3.msra.mxu0 %v1124_v1 }
 0x31a   :  { %2058 = vmatprep.subr.mxu0 %v1123_v6 }
 0x31b   :  { %2059 = vmatpush3.msra.mxu0 %v1123_v6 }
 0x31c   :  { %2061 = vmatmul.mubr.f32.vlgmr.msra.gmra.mxu0 %v1121_v7  ;;  %2098 = vmatprep.subr.mxu0 %v2245_v34 }
 0x31d   :  { %2099 = vmatpush3.msra.mxu0 %v2403_v35  ;;  %2130 = vmatprep.mubr.msk.f32.mxu0 %vm2246_vm0, %v2245_v34 }
 0x31e   :  { %2100 = vmatprep.subr.mxu0 %v2245_v34 }
 0x31f   :  { %2101 = vmatpush3.msra.mxu0 %v2411_v36 }
 0x320   :  { %2102 = vmatprep.subr.mxu0 %v2245_v34 }
 0x321   :  { %2103 = vmatpush3.msra.mxu0 %v2420_v37 }
 0x322   :  { %2104 = vmatprep.subr.mxu0 %v2245_v34 }
 0x323   :  { %2105 = vmatpush3.msra.mxu0 %v2429_v38 }
 0x324   :  { %2106 = vmatprep.subr.mxu0 %v2245_v34 }
 0x325   :  { %2107 = vmatpush3.msra.mxu0 %v2438_v39 }
 0x326   :  { %2108 = vmatprep.subr.mxu0 %v2245_v34 }
 0x327   :  { %2109 = vmatpush3.msra.mxu0 %v2447_v40 }
 0x328   :  { %2110 = vmatprep.subr.mxu0 %v2245_v34 }
 0x329   :  { %2111 = vmatpush3.msra.mxu0 %v2456_v41  ;;  %v1592_v41 = vld [vmem:[%s2731_s5] ss:$0 sm:$0xff]  ;;  %s1595_s5 = sld [smem:[#allocation8 + $0x1]] }
 0x32a   :  { %2112 = vmatprep.subr.mxu0 %v2245_v34 }
 0x32b   :  { %2113 = vmatpush3.msra.mxu0 %v2465_v42 }
 0x32c   :  { %2114 = vmatprep.subr.mxu0 %v2245_v34 }
 0x32d   :  { %2115 = vmatpush3.msra.mxu0 %v2474_v43 }
 0x32e   :  { %2116 = vmatprep.subr.mxu0 %v2245_v34 }
 0x32f   :  { %2117 = vmatpush3.msra.mxu0 %v2483_v44 }
 0x330   :  { %2118 = vmatprep.subr.mxu0 %v2245_v34 }
 0x331   :  { %2119 = vmatpush3.msra.mxu0 %v2492_v45 }
 0x332   :  { %2120 = vmatprep.subr.mxu0 %v2245_v34 }
 0x333   :  { %2121 = vmatpush3.msra.mxu0 %v2501_v46 }
 0x334   :  { %2122 = vmatprep.subr.mxu0 %v2245_v34 }
 0x335   :  { %2123 = vmatpush3.msra.mxu0 %v2510_v47 }
 0x336   :  { %2124 = vmatprep.subr.mxu0 %v2245_v34 }
 0x337   :  { %2125 = vmatpush3.msra.mxu0 %v2519_v48 }
 0x338   :  { %2126 = vmatprep.subr.mxu0 %v2245_v34 }
 0x339   :  { %2127 = vmatpush3.msra.mxu0 %v2528_v49 }
 0x33a   :  { %2128 = vmatprep.subr.mxu0 %v2245_v34 }
 0x33b   :  { %2129 = vmatpush3.msra.mxu0 %v2534_v50 }
 0x3b7   :  { %v2027_v36 = vpop.f32.mrf.mxu1 }
 0x3b9   :  { %v1093_v39 = vpop.f32.mrf.mxu1 }
 0x3bc   :  { %v1992_v35 = vpop.f32.mrf.mxu0 }
 0x3bd   :  { %v1099_v38 = vadd.f32 %v2027_v36, %v1992_v35 }
 0x3be   :  { %v1018_v37 = vpop.f32.mrf.mxu0 }
 0x3bf   :  { %v1094_v42 = vadd.f32 %v1093_v39, %v1018_v37 }
 0x3dc   :  { %v2062_v40 = vpop.f32.mrf.mxu0 }
 0x3dd   :  { %v1215_v43 = vadd.f32 %v2062_v40, %v1099_v38 }
 0x3de   :  { %v1205_v44 = vpop.f32.mrf.mxu0 }
 0x3df   :  { %v1224_v45 = vadd.f32 %v1592_v41, %v1215_v43  ;;  %v1214_v46 = vadd.f32 %v1205_v44, %v1094_v42 }
 0x3e1   :  { %v1223_v47 = vadd.f32 %v1592_v41, %v1214_v46  ;;  %v1233_v48 = vmul.f32 %v1224_v45, %v1224_v45 }
 0x3e3   :  { %v1225_v49 = vadd.f32 %v1224_v45, %v1223_v47  ;;  %v1232_v3 = vmul.f32 %v1223_v47, %v1223_v47 }
 0x3e5   :  { %v1226_v50 = vrot.slane %v1225_v49, 4  ;;  %v1234_v8 = vadd.f32 %v1233_v48, %v1232_v3 }
 0x3e7   :  { %v1227_v9 = vadd.f32 %v1226_v50, %v1225_v49  ;;  %v1235_v10 = vrot.slane %v1234_v8, 4 }
 0x3e9   :  { %v1228_v11 = vrot.slane %v1227_v9, 2  ;;  %v1236_v13 = vadd.f32 %v1235_v10, %v1234_v8 }
 0x3eb   :  { %v1229_v14 = vadd.f32 %v1228_v11, %v1227_v9  ;;  %v1237_v15 = vrot.slane %v1236_v13, 2 }
 0x3ed   :  { %v1230_v16 = vrot.slane %v1229_v14, 1  ;;  %v1238_v17 = vadd.f32 %v1237_v15, %v1236_v13 }
 0x3ef   :  { %v1231_v19 = vadd.f32 %v1230_v16, %v1229_v14  ;;  %v1239_v20 = vrot.slane %v1238_v17, 1 }
 0x3f1   :  { %2096 = vmatmul.mubr.f32.vlgmr.msra.gmra.mxu1 %v1231_v19  ;;  %v1240_v22 = vadd.f32 %v1239_v20, %v1238_v17 }
 0x3f2   :  { %2134 = vmatpush3.msra.mxu1 %v2568_v54  ;;  %2135 = vmatprep.mubr.msk.f32.mxu1 %vm2246_vm0, %v2245_v34 }
 0x3f3   :  { %2131 = vmatmul.mubr.f32.vlgmr.msra.gmra.mxu0 %v1240_v22  ;;  %2138 = vmatprep.subr.mxu1 %v2245_v34 }
 0x4b1   :  { %v1307_v23 = vpop.f32.mrf.mxu1 }
 0x4b2   :  { %v1311_v18 = vmul.f32 0.00390625, %v1307_v23 }
 0x4b3   :  { %v2097_v21 = vpop.f32.mrf.mxu1  ;;  %v1378_v24 = vpop.f32.mrf.mxu0 }
 0x4b4   :  { %v1383_v25 = vmul.f32 %v1311_v18, %v1311_v18  ;;  %v1382_v26 = vmul.f32 0.00390625, %v1378_v24 }
 0x4b5   :  { %v2132_v27 = vpop.f32.mrf.mxu0 }
 0x4b6   :  { %v1384_v28 = vsub.f32 %v1382_v26, %v1383_v25 }
 0x4b8   :  { %v1385_v29 = vadd.f32 1e-05, %v1384_v28 }
 0x4ba   :  { %2156 = vrsqrt.f32 %v1385_v29 }
 0x4c7   :  { %v2157_v30 = vpop.eup %2156 }
 0x4c8   :  { %v1388_v31 = vrot.slane %v2157_v30, 6 }
 0x4ca   :  { %v1390_v32 = vmul.f32 %v1388_v31, %v2587_v12 }
 0x4cc   :  { %v1392_v56 = vrot.slane %v1390_v32, 2 }
 0x4ce   :  { %v1394_v33 = vmul.f32 %v1392_v56, %v1311_v18  ;;  %2136 = vmatmul.mubr.msk.f32.vlgmr.msra.gmra.mxu1 %vm730_vm1, %v1392_v56 }
 0x4cf   :  { %2139 = vmatpush3.msra.mxu1 %v2568_v54  ;;  %2140 = vmatprep.mubr.msk.f32.mxu1 %vm2246_vm0, %v2245_v34  ;;  %v1562_v34 = vstv %s1595_s5 }
 0x4d0   :  { %v1396_v51 = vrot.slane %v1394_v33, 5 }
 0x4d2   :  { %v1398_v52 = vsub.f32 %v2587_v12, %v1396_v51  ;;  %v2158_v12 = vld [vmem:[%s2726_s0] sm:$0xff] }
 0x4d4   :  { %v1472_v53 = vrot.slane %v1398_v52, 3 }
 0x4d6   :  { %2141 = vmatmul.mubr.msk.f32.vlgmr.msra.gmra.mxu1 %vm730_vm1, %v1472_v53 }
 0x58e   :  { %v1467_v55 = vpop.f32.mrf.mxu1 }
 0x58f   :  { %v1548_v58 = vrot.slane %v1467_v55, %v2600_v5 }
 0x590   :  { %v2137_v57 = vpop.f32.mrf.mxu1 }
 0x591   :  { %v1549_v60 = vmul.f32 %v1548_v58, %v1223_v47  ;;  %v1550_v61 = vmul.f32 %v1548_v58, %v1224_v45 }
 0x596   :  { %v1541_v59 = vpop.f32.mrf.mxu1 }
 0x597   :  { %v1554_v62 = vrot.slane %v1541_v59, %v2600_v5 }
 0x598   :  { %v2142_v54 = vpop.f32.mrf.mxu1 }
 0x599   :  { %v1555_v63 = vadd.f32 %v1554_v62, %v1549_v60  ;;  %v1556_v0 = vadd.f32 %v1554_v62, %v1550_v61 }
 0x59b   :  { %v1557_v1 = vadd.f32 %v2158_v12, %v1555_v63  ;;  %v1558_v4 = vadd.f32 %v2159_v2, %v1556_v0 }
 0x59d   :  { %vm1560_vm6 = vcmp.ge.f32.partialorder %v1557_v1, 0.0  ;;  %vm1561_vm7 = vcmp.ge.f32.partialorder %v1558_v4, 0.0  ;;  %v1563_v6 = vmul.f32 %v1562_v34, %v1557_v1  ;;  %v1564_v5 = vmul.f32 %v1562_v34, %v1558_v4 }
 0x59f   :  { %v1565_v7 = vsel %vm1560_vm6, %v1557_v1, %v1563_v6  ;;  %v1566_v35 = vsel %vm1561_vm7, %v1558_v4, %v1564_v5 }
 0x5a0   :  { %1567 = vst [vmem:[#allocation9] sm:$0xff] %v1565_v7  ;;  %1568 = vst [vmem:[#allocation9 + $0x8] sm:$0xff] %v1566_v35 }
 0x5a1   :  { %2223 = shalt.err (!%p2220_p5)
}
 0x5a2   :  { %1580 = dma.vmem_to_hbm [thread:$0]  %s1575_s16, 256, %s2737_s11, [#allocation4], %s2241_s20, %s2241_s20, %s2242_s21  }
 0x5a3   :  { %2238 = dma.done.wait [#allocation4], 256  }
 0x5a4   :  { %2239 = vsyncadd [#allocation4], 4294967040 }
 0x5a5   :  { %1584 = vsyncpa [#allocation3], 1 }
 0x5a6   :  { %1585 = vsyncpa [#allocation7], 1 }
 0x5a7   :  { %1586 = vsyncpa [#allocation4], 1 }
 0x5a8   :  { %1587 = vsyncpa [#allocation5], 1 }

</bundles_post_ra>
